<compile_context>
chip_gen: v6e
topology: v6e:2x2x1
jax: 0.10.0
libtpu: 0.0.40
codegen_flags: <defaults>
</compile_context>

<pallas_src>
import functools

import jax
import jax.numpy as jnp
from jax.experimental import pallas as pl
from jax.experimental.pallas import tpu as pltpu


# --------------------------------------------------------------------------
# small helpers
# --------------------------------------------------------------------------
def _round_up(x, m):
    return ((x + m - 1) // m) * m


def _l2_normalize(x, eps=1e-12):
    return x / jnp.maximum(jnp.sqrt(jnp.sum(x * x, axis=1, keepdims=True)), eps)


def _int_pow(x, p: int):
    """x**p for a non-negative Python int p, as explicit VPU multiplies."""
    if p == 0:
        return jnp.ones_like(x)
    r = x
    for _ in range(p - 1):
        r = r * x
    return r


def _choose_tile(n_pad, max_tile=768):
    """Largest multiple-of-128 divisor of n_pad that is <= max_tile, preferring
    >= 2 blocks so the parallel grid axis can feed both v7x TensorCores."""
    cands = [t for t in range(128, min(max_tile, n_pad) + 1, 128) if n_pad % t == 0]
    multi = [t for t in cands if n_pad // t >= 2]
    return max(multi) if multi else max(cands)


def _similarity_weight(sim, alpha, beta):
    """f32 weight w[i,j] = relu(alpha - sim[i,j])^beta, masked to (sim < alpha)
    and with the diagonal zeroed. Boundary decided in f32 (review note)."""
    n = sim.shape[0]
    simf = sim.astype(jnp.float32)
    mask = (simf < alpha) & ~jnp.eye(n, dtype=bool)
    sa = jnp.where(mask, jnp.float32(alpha) - simf, 1.0)
    return jnp.where(mask, sa ** jnp.float32(beta), 0.0)


# --------------------------------------------------------------------------
# Pallas kernel 1: textual-similarity loss hot path
# --------------------------------------------------------------------------
def _tss_kernel(bi_ref, bj_ref, ws_ref, e_ref, out_ref, *, beta, tile):
    """One upper-triangular (tile, tile) block pair of sum(ws * relu(cos)^(b+1))."""
    t = pl.program_id(0)
    bi = bi_ref[t]
    bj = bj_ref[t]

    # Slice the single full-resident normalized-embedding block for both the
    # i- and j-operands (sublane-dim dynamic slices, tile-aligned).
    i0 = pl.multiple_of(bi * tile, tile)
    j0 = pl.multiple_of(bj * tile, tile)
    e_i = e_ref[pl.ds(i0, tile), :]
    e_j = e_ref[pl.ds(j0, tile), :]

    # cos tile = e_i @ e_j.T   (bf16 x bf16 -> f32 on the MXU)
    cos = jax.lax.dot_general(
        e_i, e_j,
        dimension_numbers=(((1,), (1,)), ((), ())),
        preferred_element_type=jnp.float32)
    sc = jnp.maximum(cos, 0.0)

    # relu(cos)^(beta+1), specialized on beta (integer beta -> pure VPU muls).
    p = float(beta) + 1.0
    if p.is_integer() and p >= 1:
        f = _int_pow(sc, int(p))
    else:
        pos = sc > 0.0
        f = jnp.where(pos, jnp.exp(p * jnp.log(jnp.where(pos, sc, 1.0))), 0.0)

    # Streamed weight is bf16; upconvert right after load, compute in f32.
    term = ws_ref[...].astype(jnp.float32) * f

    # Fold (tile, tile) -> (8, tile) lane-dense partial with aligned sublane
    # group adds; diagonal block pairs are halved (they double-count via ws).
    folded = term[0:8, :]
    for r0 in range(8, tile, 8):
        folded = folded + term[r0:r0 + 8, :]
    scale = jnp.where(bi == bj, jnp.float32(0.5), jnp.float32(1.0))
    out_ref[...] = folded * scale


@functools.partial(jax.jit, static_argnames=("alpha", "beta", "max_tile"))
def _tss_loss_term(e, sim, *, alpha, beta, max_tile=768):
    """sum_{i != j, sim[i,j] < alpha} relu(alpha-sim)^beta * relu(cos)^(beta+1)."""
    n, d = e.shape
    assert sim.shape == (n, n)

    # Normalize rows once in f32, feed the MXU bf16.
    en = _l2_normalize(e.astype(jnp.float32)).astype(jnp.bfloat16)

    # Pre-fold sim into the symmetric weight ws = w + w^T (f32, then bf16).
    w = _similarity_weight(sim, alpha, beta)
    ws = w + w.T

    # Pad N to a multiple of 128 only; tile is a divisor of the padded N.
    n_pad = _round_up(n, 128)
    if n_pad != n:
        p = n_pad - n
        en = jnp.pad(en, ((0, p), (0, 0)))   # zero rows  -> relu(cos) = 0
        ws = jnp.pad(ws, ((0, p), (0, p)))   # zero weight
    ws = ws.astype(jnp.bfloat16)

    tile = _choose_tile(n_pad, max_tile)
    nblk = n_pad // tile

    # Upper-triangular block-pair schedule via scalar prefetch.
    pairs = [(i, j) for i in range(nblk) for j in range(i, nblk)]
    bi_idx = jnp.asarray([p[0] for p in pairs], dtype=jnp.int32)
    bj_idx = jnp.asarray([p[1] for p in pairs], dtype=jnp.int32)
    t_steps = len(pairs)

    kernel = functools.partial(_tss_kernel, beta=float(beta), tile=tile)

    cost = pl.CostEstimate(
        flops=2 * t_steps * tile * tile * d,
        transcendentals=(0 if (float(beta).is_integer() and beta >= 0)
                         else 2 * t_steps * tile * tile),
        bytes_accessed=(t_steps * tile * tile * 2      # ws bf16 tiles
                        + n_pad * d * 2                # resident embeddings
                        + t_steps * 8 * tile * 4))     # partial outputs

    out = pl.pallas_call(
        kernel,
        out_shape=jax.ShapeDtypeStruct((t_steps * 8, tile), jnp.float32),
        grid_spec=pltpu.PrefetchScalarGridSpec(
            num_scalar_prefetch=2,
            grid=(t_steps,),
            in_specs=[
                # ws tile for block pair (bi[t], bj[t])
                pl.BlockSpec((tile, tile), lambda t, bi, bj: (bi[t], bj[t])),
                # normalized embeddings, full-resident (constant block index)
                pl.BlockSpec((n_pad, d), lambda t, bi, bj: (0, 0)),
            ],
            out_specs=pl.BlockSpec((8, tile), lambda t, bi, bj: (t, 0)),
        ),
        compiler_params=pltpu.CompilerParams(
            dimension_semantics=("parallel",),
            vmem_limit_bytes=48 * 1024 * 1024),
        cost_estimate=cost,
    )(bi_idx, bj_idx, ws, en)

    # Lane-dense (8, tile) partials -> scalar (tiny, done by XLA).
    return jnp.sum(out)


def textual_similarity_loss(e_m, e_a, mashup_sim, api_sim,
                            alpha1, alpha2, beta, lambda_tss, max_tile=768):
    loss_mss = _tss_loss_term(e_m, mashup_sim, alpha=float(alpha1),
                              beta=float(beta), max_tile=int(max_tile))
    loss_atss = _tss_loss_term(e_a, api_sim, alpha=float(alpha2),
                               beta=float(beta), max_tile=int(max_tile))
    return lambda_tss * (loss_mss + loss_atss)


# --------------------------------------------------------------------------
# Pallas kernel 2: text MLP -> L2 normalize -> 0.5*(g + t)   (forward combine)
# --------------------------------------------------------------------------
def _text_combine_kernel(g_ref, x_ref, w_ref, b_ref, o_ref):
    t = jnp.dot(x_ref[...], w_ref[...], preferred_element_type=jnp.float32)
    t = t + b_ref[...]
    nrm = jnp.sqrt(jnp.sum(t * t, axis=1, keepdims=True))
    t = t / jnp.maximum(nrm, 1e-12)
    o_ref[...] = 0.5 * (g_ref[...] + t)


def _text_mlp_normalize_combine(g, x, w, b):
    n, d = g.shape
    tdim = x.shape[1]
    tm = 128
    n_pad = _round_up(n, tm)
    if n_pad != n:
        p = n_pad - n
        g = jnp.pad(g, ((0, p), (0, 0)))
        x = jnp.pad(x, ((0, p), (0, 0)))
    out = pl.pallas_call(
        _text_combine_kernel,
        out_shape=jax.ShapeDtypeStruct((n_pad, d), jnp.float32),
        grid=(n_pad // tm,),
        in_specs=[
            pl.BlockSpec((tm, d), lambda i: (i, 0)),
            pl.BlockSpec((tm, tdim), lambda i: (i, 0)),
            pl.BlockSpec((tdim, d), lambda i: (0, 0)),
            pl.BlockSpec((1, d), lambda i: (0, 0)),
        ],
        out_specs=pl.BlockSpec((tm, d), lambda i: (i, 0)),
        compiler_params=pltpu.CompilerParams(
            dimension_semantics=("parallel",)),
    )(g, x, w, b.reshape(1, d))
    return out[:n]


# --------------------------------------------------------------------------
# TSSGCF forward (module semantics)
# --------------------------------------------------------------------------
@functools.partial(jax.jit, static_argnames=("n_layers",))
def tssgcf_forward(params, adj_mashup, adj_api, mashup_text, api_text, n_layers=3):
    # TODO(synk): the real model uses torch.sparse.mm on a sparse adjacency;
    # general sparse x dense has no clean Pallas TPU mapping, so the LightGCN
    # propagation is left to XLA (dense here). Note the PyTorch code computes
    # the layer-mean inside the API loop, but the returned value equals the
    # mean over all layers, which is what we compute.
    def propagate(adj, x0):
        layers = [x0]
        x = x0
        for _ in range(n_layers):
            x = adj @ x
            layers.append(x)
        out = jnp.mean(jnp.stack(layers), axis=0)
        return _l2_normalize(out)

    g_m = propagate(adj_mashup, params["mashup_emb"])
    g_a = propagate(adj_api, params["api_emb"])

    f_m = _text_mlp_normalize_combine(g_m, mashup_text, params["text_w"], params["text_b"])
    f_a = _text_mlp_normalize_combine(g_a, api_text, params["text_w"], params["text_b"])
    return f_m, f_a


# --------------------------------------------------------------------------
# plain-JAX references
# --------------------------------------------------------------------------
def _forward_reference(params, adj_m, adj_a, m_text, a_text, n_layers):
    def propagate(adj, x0):
        layers = [x0]
        x = x0
        for _ in range(n_layers):
            x = adj @ x
            layers.append(x)
        return _l2_normalize(jnp.mean(jnp.stack(layers), axis=0))

    def combine(g, x):
        t = x @ params["text_w"] + params["text_b"]
        return 0.5 * (g + _l2_normalize(t))

    g_m = propagate(adj_m, params["mashup_emb"])
    g_a = propagate(adj_a, params["api_emb"])
    return combine(g_m, m_text), combine(g_a, a_text)


def _loss_reference(e_m, e_a, mashup_sim, api_sim, alpha1, alpha2, beta,
                    lambda_tss, mimic_kernel_dtypes=False):
    def term(e, sim, alpha):
        en = _l2_normalize(e.astype(jnp.float32))
        if mimic_kernel_dtypes:
            en = en.astype(jnp.bfloat16).astype(jnp.float32)
        cos = en @ en.T
        f = jnp.power(jnp.maximum(cos, 0.0), beta + 1.0)
        w = _similarity_weight(sim, alpha, beta)
        if mimic_kernel_dtypes:
            ws = (w + w.T).astype(jnp.bfloat16).astype(jnp.float32)
            return 0.5 * jnp.sum(ws * f)
        return jnp.sum(w * f)

    return lambda_tss * (term(e_m, mashup_sim, alpha1)
                         + term(e_a, api_sim, alpha2))


# --------------------------------------------------------------------------
# demo / smoke test
# --------------------------------------------------------------------------
if __name__ == "__main__":
    # Small, deliberately non-128-multiple stand-ins for the real sizes
    # (2289 mashups / 956 APIs, emb_dim = 64, text dim = 384).
    NUM_M, NUM_A, EMB, TEXT_DIM, N_LAYERS = 200, 120, 64, 384, 3
    ALPHA1, ALPHA2, BETA, LAMBDA_TSS = 0.5, 0.4, 2.0, 0.01

    key = jax.random.PRNGKey(0)
    ks = jax.random.split(key, 8)

    params = {
        "mashup_emb": 0.1 * jax.random.normal(ks[0], (NUM_M, EMB), jnp.float32),
        "api_emb": 0.1 * jax.random.normal(ks[1], (NUM_A, EMB), jnp.float32),
        "text_w": jax.random.normal(ks[2], (TEXT_DIM, EMB), jnp.float32) / jnp.sqrt(TEXT_DIM),
        "text_b": 0.01 * jax.random.normal(ks[3], (EMB,), jnp.float32),
    }

    def make_adj(k, n):
        k1, k2 = jax.random.split(k)
        mask = (jax.random.uniform(k1, (n, n)) < 0.05).astype(jnp.float32)
        a = mask * jax.random.uniform(k2, (n, n))
        a = 0.5 * (a + a.T)
        return a / jnp.maximum(jnp.sum(a, axis=1, keepdims=True), 1e-8)

    adj_m = make_adj(ks[4], NUM_M)
    adj_a = make_adj(ks[5], NUM_A)

    m_text = jax.random.normal(ks[6], (NUM_M, TEXT_DIM), jnp.float32)
    a_text = jax.random.normal(ks[7], (NUM_A, TEXT_DIM), jnp.float32)

    # "Precomputed" textual similarity matrices (cosine of the raw text).
    def cos_sim(x):
        xn = _l2_normalize(x)
        return xn @ xn.T

    mashup_sim = cos_sim(m_text)
    api_sim = cos_sim(a_text)

    # ---- forward pass (module semantics; combine step runs in Pallas) ----
    f_m, f_a = tssgcf_forward(params, adj_m, adj_a, m_text, a_text,
                              n_layers=N_LAYERS)
    f_m, f_a = jax.block_until_ready((f_m, f_a))

    fr_m, fr_a = _forward_reference(params, adj_m, adj_a, m_text, a_text, N_LAYERS)
    assert jnp.allclose(f_m, fr_m, rtol=1e-2, atol=2e-3)
    assert jnp.allclose(f_a, fr_a, rtol=1e-2, atol=2e-3)

    # ---- textual-similarity loss hot path (main Pallas kernel) ----
    loss = textual_similarity_loss(f_m, f_a, mashup_sim, api_sim,
                                   ALPHA1, ALPHA2, BETA, LAMBDA_TSS)
    loss = jax.block_until_ready(loss)

    # Tight check vs a reference that mirrors the kernel's bf16 rounding.
    ref_tight = _loss_reference(f_m, f_a, mashup_sim, api_sim, ALPHA1, ALPHA2,
                                BETA, LAMBDA_TSS, mimic_kernel_dtypes=True)
    assert jnp.allclose(loss, ref_tight, rtol=5e-4, atol=1e-3), (loss, ref_tight)

    # Looser check vs the pure-f32 PyTorch-equivalent reference.
    ref_f32 = _loss_reference(f_m, f_a, mashup_sim, api_sim, ALPHA1, ALPHA2,
                              BETA, LAMBDA_TSS, mimic_kernel_dtypes=False)
    assert jnp.allclose(loss, ref_f32, rtol=2e-2, atol=1e-2), (loss, ref_f32)

    print("KERNEL_OK")
</pallas_src>

<mosaic_0001>
module attributes {stable_mosaic.version = 11 : i64} {
  func.func @_text_combine_kernel(%arg0: i32, %arg1: memref<128x64xf32, #tpu.memory_space<vmem>>, %arg2: memref<128x384xf32, #tpu.memory_space<vmem>>, %arg3: memref<384x64xf32, #tpu.memory_space<vmem>>, %arg4: memref<1x64xf32, #tpu.memory_space<vmem>>, %arg5: memref<128x64xf32, #tpu.memory_space<vmem>>) attributes {dimension_semantics = [#tpu.dimension_semantics<parallel>], iteration_bounds = array<i64: 2>, scalar_prefetch = 0 : i64, scratch_operands = 0 : i64, tpu.core_type = #tpu.core_type<tc>, window_params = [{transform_indices = @transform_0, window_bounds = array<i64: 128, 64>}, {transform_indices = @transform_1, window_bounds = array<i64: 128, 384>}, {pipeline_mode = #tpu.pipeline_mode<synchronous>, transform_indices = @transform_2, window_bounds = array<i64: 384, 64>}, {pipeline_mode = #tpu.pipeline_mode<synchronous>, transform_indices = @transform_3, window_bounds = array<i64: 1, 64>}, {transform_indices = @transform_4, window_bounds = array<i64: 128, 64>}]} {
    %c0 = arith.constant 0 : index
    %c0_0 = arith.constant 0 : index
    %0 = vector.load %arg2[%c0, %c0_0] : memref<128x384xf32, #tpu.memory_space<vmem>>, vector<128x384xf32>
    %c0_1 = arith.constant 0 : index
    %c0_2 = arith.constant 0 : index
    %1 = vector.load %arg3[%c0_1, %c0_2] : memref<384x64xf32, #tpu.memory_space<vmem>>, vector<384x64xf32>
    %cst = arith.constant dense<0.000000e+00> : vector<128x64xf32>
    %2 = tpu.matmul %0, %1, %cst {dimension_numbers = #tpu.dot_dimension_numbers<[1], [0], [0], [1], [0, 0, 1, 1], [], []>} : vector<128x384xf32>, vector<384x64xf32>, vector<128x64xf32> -> vector<128x64xf32>
    %c0_3 = arith.constant 0 : index
    %c0_4 = arith.constant 0 : index
    %3 = vector.load %arg4[%c0_3, %c0_4] : memref<1x64xf32, #tpu.memory_space<vmem>>, vector<1x64xf32>
    %4 = vector.broadcast %3 : vector<1x64xf32> to vector<128x64xf32>
    %5 = arith.addf %2, %4 : vector<128x64xf32>
    %6 = arith.mulf %5, %5 : vector<128x64xf32>
    %cst_5 = arith.constant dense<0.000000e+00> : vector<128xf32>
    %7 = vector.multi_reduction <add>, %6, %cst_5 [1] : vector<128x64xf32> to vector<128xf32>
    %8 = vector.shape_cast %7 : vector<128xf32> to vector<128x1xf32>
    %9 = math.sqrt %8 : vector<128x1xf32>
    %cst_6 = arith.constant 9.99999996E-13 : f32
    %10 = vector.broadcast %cst_6 : f32 to vector<128x1xf32>
    %11 = arith.maximumf %9, %10 : vector<128x1xf32>
    %12 = vector.broadcast %11 : vector<128x1xf32> to vector<128x64xf32>
    %13 = arith.divf %5, %12 : vector<128x64xf32>
    %c0_7 = arith.constant 0 : index
    %c0_8 = arith.constant 0 : index
    %14 = vector.load %arg1[%c0_7, %c0_8] : memref<128x64xf32, #tpu.memory_space<vmem>>, vector<128x64xf32>
    %15 = arith.addf %14, %13 : vector<128x64xf32>
    %cst_9 = arith.constant 5.000000e-01 : f32
    %16 = vector.broadcast %cst_9 : f32 to vector<128x64xf32>
    %17 = arith.mulf %16, %15 : vector<128x64xf32>
    %c0_10 = arith.constant 0 : index
    %c0_11 = arith.constant 0 : index
    %18 = vector.load %arg5[%c0_10, %c0_11] : memref<128x64xf32, #tpu.memory_space<vmem>>, vector<128x64xf32>
    tpu.vector_store %arg5[%c0_10, %c0_11], %17 {strides = array<i32>} : memref<128x64xf32, #tpu.memory_space<vmem>>, vector<128x64xf32>,
    return
  }
  func.func @transform_0(%arg0: i32) -> (i32, i32) {
    %c0_i32 = arith.constant 0 : i32
    %c0_i32_0 = arith.constant 0 : i32
    return %arg0, %c0_i32 : i32, i32
  }
  func.func @transform_1(%arg0: i32) -> (i32, i32) {
    %c0_i32 = arith.constant 0 : i32
    %c0_i32_0 = arith.constant 0 : i32
    return %arg0, %c0_i32 : i32, i32
  }
  func.func @transform_2(%arg0: i32) -> (i32, i32) {
    %c0_i32 = arith.constant 0 : i32
    %c0_i32_0 = arith.constant 0 : i32
    %c0_i32_1 = arith.constant 0 : i32
    return %c0_i32, %c0_i32_0 : i32, i32
  }
  func.func @transform_3(%arg0: i32) -> (i32, i32) {
    %c0_i32 = arith.constant 0 : i32
    %c0_i32_0 = arith.constant 0 : i32
    %c0_i32_1 = arith.constant 0 : i32
    return %c0_i32, %c0_i32_0 : i32, i32
  }
  func.func @transform_4(%arg0: i32) -> (i32, i32) {
    %c0_i32 = arith.constant 0 : i32
    %c0_i32_0 = arith.constant 0 : i32
    return %arg0, %c0_i32 : i32, i32
  }
}

module attributes {stable_mosaic.version = 11 : i64} {
  func.func @_text_combine_kernel(%arg0: i32, %arg1: memref<128x64xf32, #tpu.memory_space<vmem>>, %arg2: memref<128x384xf32, #tpu.memory_space<vmem>>, %arg3: memref<384x64xf32, #tpu.memory_space<vmem>>, %arg4: memref<1x64xf32, #tpu.memory_space<vmem>>, %arg5: memref<128x64xf32, #tpu.memory_space<vmem>>) attributes {dimension_semantics = [#tpu.dimension_semantics<parallel>], iteration_bounds = array<i64: 1>, scalar_prefetch = 0 : i64, scratch_operands = 0 : i64, tpu.core_type = #tpu.core_type<tc>, window_params = [{transform_indices = @transform_0, window_bounds = array<i64: 128, 64>}, {transform_indices = @transform_1, window_bounds = array<i64: 128, 384>}, {pipeline_mode = #tpu.pipeline_mode<synchronous>, transform_indices = @transform_2, window_bounds = array<i64: 384, 64>}, {pipeline_mode = #tpu.pipeline_mode<synchronous>, transform_indices = @transform_3, window_bounds = array<i64: 1, 64>}, {transform_indices = @transform_4, window_bounds = array<i64: 128, 64>}]} {
    %c0 = arith.constant 0 : index
    %c0_0 = arith.constant 0 : index
    %0 = vector.load %arg2[%c0, %c0_0] : memref<128x384xf32, #tpu.memory_space<vmem>>, vector<128x384xf32>
    %c0_1 = arith.constant 0 : index
    %c0_2 = arith.constant 0 : index
    %1 = vector.load %arg3[%c0_1, %c0_2] : memref<384x64xf32, #tpu.memory_space<vmem>>, vector<384x64xf32>
    %cst = arith.constant dense<0.000000e+00> : vector<128x64xf32>
    %2 = tpu.matmul %0, %1, %cst {dimension_numbers = #tpu.dot_dimension_numbers<[1], [0], [0], [1], [0, 0, 1, 1], [], []>} : vector<128x384xf32>, vector<384x64xf32>, vector<128x64xf32> -> vector<128x64xf32>
    %c0_3 = arith.constant 0 : index
    %c0_4 = arith.constant 0 : index
    %3 = vector.load %arg4[%c0_3, %c0_4] : memref<1x64xf32, #tpu.memory_space<vmem>>, vector<1x64xf32>
    %4 = vector.broadcast %3 : vector<1x64xf32> to vector<128x64xf32>
    %5 = arith.addf %2, %4 : vector<128x64xf32>
    %6 = arith.mulf %5, %5 : vector<128x64xf32>
    %cst_5 = arith.constant dense<0.000000e+00> : vector<128xf32>
    %7 = vector.multi_reduction <add>, %6, %cst_5 [1] : vector<128x64xf32> to vector<128xf32>
    %8 = vector.shape_cast %7 : vector<128xf32> to vector<128x1xf32>
    %9 = math.sqrt %8 : vector<128x1xf32>
    %cst_6 = arith.constant 9.99999996E-13 : f32
    %10 = vector.broadcast %cst_6 : f32 to vector<128x1xf32>
    %11 = arith.maximumf %9, %10 : vector<128x1xf32>
    %12 = vector.broadcast %11 : vector<128x1xf32> to vector<128x64xf32>
    %13 = arith.divf %5, %12 : vector<128x64xf32>
    %c0_7 = arith.constant 0 : index
    %c0_8 = arith.constant 0 : index
    %14 = vector.load %arg1[%c0_7, %c0_8] : memref<128x64xf32, #tpu.memory_space<vmem>>, vector<128x64xf32>
    %15 = arith.addf %14, %13 : vector<128x64xf32>
    %cst_9 = arith.constant 5.000000e-01 : f32
    %16 = vector.broadcast %cst_9 : f32 to vector<128x64xf32>
    %17 = arith.mulf %16, %15 : vector<128x64xf32>
    %c0_10 = arith.constant 0 : index
    %c0_11 = arith.constant 0 : index
    %18 = vector.load %arg5[%c0_10, %c0_11] : memref<128x64xf32, #tpu.memory_space<vmem>>, vector<128x64xf32>
    tpu.vector_store %arg5[%c0_10, %c0_11], %17 {strides = array<i32>} : memref<128x64xf32, #tpu.memory_space<vmem>>, vector<128x64xf32>,
    return
  }
  func.func @transform_0(%arg0: i32) -> (i32, i32) {
    %c0_i32 = arith.constant 0 : i32
    %c0_i32_0 = arith.constant 0 : i32
    return %arg0, %c0_i32 : i32, i32
  }
  func.func @transform_1(%arg0: i32) -> (i32, i32) {
    %c0_i32 = arith.constant 0 : i32
    %c0_i32_0 = arith.constant 0 : i32
    return %arg0, %c0_i32 : i32, i32
  }
  func.func @transform_2(%arg0: i32) -> (i32, i32) {
    %c0_i32 = arith.constant 0 : i32
    %c0_i32_0 = arith.constant 0 : i32
    %c0_i32_1 = arith.constant 0 : i32
    return %c0_i32, %c0_i32_0 : i32, i32
  }
  func.func @transform_3(%arg0: i32) -> (i32, i32) {
    %c0_i32 = arith.constant 0 : i32
    %c0_i32_0 = arith.constant 0 : i32
    %c0_i32_1 = arith.constant 0 : i32
    return %c0_i32, %c0_i32_0 : i32, i32
  }
  func.func @transform_4(%arg0: i32) -> (i32, i32) {
    %c0_i32 = arith.constant 0 : i32
    %c0_i32_0 = arith.constant 0 : i32
    return %arg0, %c0_i32 : i32, i32
  }
}

</mosaic_0001>

<bundles_post_ra>
// kernel: tssgcf_forward.2
= control target key start
LH: loop header
LB: loop body
LE: loop exit
PB: predicated region body
PF: predicated region fallthrough
CT: control target
= control target key end

     0   :  { %s1264_s15 = smov 0   ;;  %s1746_s0 = inlined_call_operand.vmem [shape: f32[256,64], index: 0, kind: input, shape index: {}]   ;;  %s1747_s1 = inlined_call_operand.vmem [shape: f32[256,384], index: 1, kind: input, shape index: {}]   ;;  %s1748_s2 = inlined_call_operand.vmem [shape: f32[384,64], index: 2, kind: input, shape index: {}]   ;;  %s1749_s3 = inlined_call_operand.vmem [shape: f32[1,64], index: 3, kind: input, shape index: {}]   ;;  %s1750_s4 = inlined_call_operand.vmem [shape: f32[256,64], index: 4, kind: output, shape index: {}]  }
   0x1 LB: > { %s976_s16 = sadd.s32 4294967295, %s1237_s15   ;;  %p980_p0 = scmp.ge.s32.totalorder %s1237_s15, 1  ;;  %s1237_s15 = sphi %s1264_s15, %s14_s15  }
   0x2   : > { %p175_p1 = scmp.lt.s32.totalorder %s1237_s15, 3 }
   0x4   : > { %p176_p2 = pnand %p980_p0, %p175_p1 }
   0x5   : > { %s981_s25 = sshll.u32 (!%p176_p2), %s976_s16, 4 }
   0x6   : > { %179 = sbr.rel (%p176_p2) target bundleno = 488 (0x1e8), region = 36  ;;  %p208_p3 = scmp.lt.s32.totalorder (!%p176_p2), %s981_s25, 31 }
   0xb   : > { %v305_v0 = vld [vmem:[%s1748_s2 + $0xf8] sm:$0xff]  ;;  %v304_v2 = vld [vmem:[%s1748_s2 + $0xf0] sm:$0xff]  ;;  %v303_v5 = vld [vmem:[%s1748_s2 + $0xe8] sm:$0xff]  ;;  %s1752_s25 = smov (!%p208_p3, %s981_s25), 31  ;;  %vm635_vm0 = vcmask 523264  }
   0xc   : > { %v289_v1 = vld [vmem:[%s1748_s2 + $0x78] sm:$0xff]  ;;  %990 = vmatprep.subr.mxu0 %v305_v0  ;;  %v288_v3 = vld [vmem:[%s1748_s2 + $0x70] sm:$0xff]  ;;  %v287_v7 = vld [vmem:[%s1748_s2 + $0x68] sm:$0xff]  ;;  %s1158_s9 = smul.u32 24, %s1752_s25  ;;  %s982_s23 = sshll.u32 %s1752_s25, 3 }
   0xd   : > { %v321_v4 = vld [vmem:[%s1748_s2 + $0x178] sm:$0xff]  ;;  %991 = vmatpush3.msra.mxu0 %v289_v1  ;;  %v320_v6 = vld [vmem:[%s1748_s2 + $0x170] sm:$0xff]  ;;  %v319_v8 = vld [vmem:[%s1748_s2 + $0x168] sm:$0xff]  ;;  %s1608_s30 = scalar_lea.vmem %s1750_s4, %s982_s23 }
   0xe   : > { %1102 = vmatprep.subr.mxu1 %v321_v4  ;;  %992 = vmatprep.subr.mxu0 %v304_v2  ;;  %v302_v9 = vld [vmem:[%s1748_s2 + $0xe0] sm:$0xff]  ;;  %v301_v12 = vld [vmem:[%s1748_s2 + $0xd8] sm:$0xff]  ;;  %v300_v15 = vld [vmem:[%s1748_s2 + $0xd0] sm:$0xff]  ;;  %s1398_s27 = scalar_lea.vmem %s1747_s1, %s1158_s9 }
   0xf   : > { %1103 = vmatpush3.msra.mxu1 %v321_v4  ;;  %993 = vmatpush3.msra.mxu0 %v288_v3  ;;  %v286_v10 = vld [vmem:[%s1748_s2 + $0x60] sm:$0xff]  ;;  %v285_v13 = vld [vmem:[%s1748_s2 + $0x58] sm:$0xff]  ;;  %v284_v16 = vld [vmem:[%s1748_s2 + $0x50] sm:$0xff] }
  0x10   : > { %1104 = vmatprep.subr.mxu1 %v320_v6  ;;  %994 = vmatprep.subr.mxu0 %v303_v5  ;;  %v318_v11 = vld [vmem:[%s1748_s2 + $0x160] sm:$0xff]  ;;  %v317_v14 = vld [vmem:[%s1748_s2 + $0x158] sm:$0xff]  ;;  %v316_v17 = vld [vmem:[%s1748_s2 + $0x150] sm:$0xff] }
  0x11   : > { %1105 = vmatpush3.msra.mxu1 %v320_v6  ;;  %995 = vmatpush3.msra.mxu0 %v287_v7  ;;  %v299_v18 = vld [vmem:[%s1748_s2 + $0xc8] sm:$0xff]  ;;  %v298_v21 = vld [vmem:[%s1748_s2 + $0xc0] sm:$0xff]  ;;  %v297_v24 = vld [vmem:[%s1748_s2 + $0xb8] sm:$0xff] }
  0x12   : > { %1106 = vmatprep.subr.mxu1 %v319_v8  ;;  %996 = vmatprep.subr.mxu0 %v302_v9  ;;  %v283_v19 = vld [vmem:[%s1748_s2 + $0x48] sm:$0xff]  ;;  %v282_v22 = vld [vmem:[%s1748_s2 + $0x40] sm:$0xff]  ;;  %v281_v25 = vld [vmem:[%s1748_s2 + $0x38] sm:$0xff] }
  0x13   : > { %1107 = vmatpush3.msra.mxu1 %v319_v8  ;;  %997 = vmatpush3.msra.mxu0 %v286_v10  ;;  %v315_v20 = vld [vmem:[%s1748_s2 + $0x148] sm:$0xff]  ;;  %v314_v23 = vld [vmem:[%s1748_s2 + $0x140] sm:$0xff]  ;;  %v313_v26 = vld [vmem:[%s1748_s2 + $0x138] sm:$0xff] }
  0x14   : > { %1108 = vmatprep.subr.mxu1 %v318_v11  ;;  %998 = vmatprep.subr.mxu0 %v301_v12  ;;  %v296_v27 = vld [vmem:[%s1748_s2 + $0xb0] sm:$0xff]  ;;  %v295_v30 = vld [vmem:[%s1748_s2 + $0xa8] sm:$0xff]  ;;  %v294_v33 = vld [vmem:[%s1748_s2 + $0xa0] sm:$0xff] }
  0x15   : > { %1109 = vmatpush3.msra.mxu1 %v318_v11  ;;  %999 = vmatpush3.msra.mxu0 %v285_v13  ;;  %v280_v28 = vld [vmem:[%s1748_s2 + $0x30] sm:$0xff]  ;;  %v279_v31 = vld [vmem:[%s1748_s2 + $0x28] sm:$0xff]  ;;  %v278_v34 = vld [vmem:[%s1748_s2 + $0x20] sm:$0xff] }
  0x16   : > { %1110 = vmatprep.subr.mxu1 %v317_v14  ;;  %1000 = vmatprep.subr.mxu0 %v300_v15  ;;  %v312_v29 = vld [vmem:[%s1748_s2 + $0x130] sm:$0xff]  ;;  %v311_v32 = vld [vmem:[%s1748_s2 + $0x128] sm:$0xff]  ;;  %v310_v35 = vld [vmem:[%s1748_s2 + $0x120] sm:$0xff] }
  0x17   : > { %1111 = vmatpush3.msra.mxu1 %v317_v14  ;;  %1001 = vmatpush3.msra.mxu0 %v284_v16  ;;  %v293_v36 = vld [vmem:[%s1748_s2 + $0x98] sm:$0xff]  ;;  %v292_v39 = vld [vmem:[%s1748_s2 + $0x90] sm:$0xff]  ;;  %v291_v42 = vld [vmem:[%s1748_s2 + $0x88] sm:$0xff] }
  0x18   : > { %1112 = vmatprep.subr.mxu1 %v316_v17  ;;  %1002 = vmatprep.subr.mxu0 %v299_v18  ;;  %v277_v37 = vld [vmem:[%s1748_s2 + $0x18] sm:$0xff]  ;;  %v276_v40 = vld [vmem:[%s1748_s2 + $0x10] sm:$0xff]  ;;  %v227_v43 = vld [vmem:[%s1398_s27 + $0x8] sm:$0xff] }
  0x19   : > { %1113 = vmatpush3.msra.mxu1 %v316_v17  ;;  %1003 = vmatpush3.msra.mxu0 %v283_v19  ;;  %v309_v38 = vld [vmem:[%s1748_s2 + $0x118] sm:$0xff]  ;;  %v308_v41 = vld [vmem:[%s1748_s2 + $0x110] sm:$0xff]  ;;  %v275_v44 = vld [vmem:[%s1748_s2 + $0x8] sm:$0xff] }
  0x1a   : > { %1114 = vmatprep.subr.mxu1 %v315_v20  ;;  %1004 = vmatprep.subr.mxu0 %v298_v21  ;;  %v290_v45 = vld [vmem:[%s1748_s2 + $0x80] sm:$0xff]  ;;  %v307_v46 = vld [vmem:[%s1748_s2 + $0x108] sm:$0xff]  ;;  %v228_v51 = vld [vmem:[%s1398_s27 + $0x10] sm:$0xff] }
  0x1b   : > { %1115 = vmatpush3.msra.mxu1 %v315_v20  ;;  %1005 = vmatpush3.msra.mxu0 %v282_v22  ;;  %v274_v47 = vld [vmem:[%s1748_s2] sm:$0xff]  ;;  %v231_v52 = vld [vmem:[%s1398_s27 + $0x28] sm:$0xff]  ;;  %v229_v53 = vld [vmem:[%s1398_s27 + $0x18] sm:$0xff] }
  0x1c   : > { %1116 = vmatprep.subr.mxu1 %v314_v23  ;;  %1006 = vmatprep.subr.mxu0 %v297_v24  ;;  %v226_v48 = vld [vmem:[%s1398_s27] sm:$0xff]  ;;  %v233_v55 = vld [vmem:[%s1398_s27 + $0x38] sm:$0xff]  ;;  %v232_v57 = vld [vmem:[%s1398_s27 + $0x30] sm:$0xff] }
  0x1d   : > { %1117 = vmatpush3.msra.mxu1 %v314_v23  ;;  %1007 = vmatpush3.msra.mxu0 %v281_v25  ;;  %v306_v49 = vld [vmem:[%s1748_s2 + $0x100] sm:$0xff]  ;;  %v237_v56 = vld [vmem:[%s1398_s27 + $0x58] sm:$0xff]  ;;  %v240_v58 = vld [vmem:[%s1398_s27 + $0x70] sm:$0xff] }
  0x1e   : > { %1118 = vmatprep.subr.mxu1 %v313_v26  ;;  %1008 = vmatprep.subr.mxu0 %v296_v27  ;;  %v230_v50 = vld [vmem:[%s1398_s27 + $0x20] sm:$0xff]  ;;  %v236_v59 = vld [vmem:[%s1398_s27 + $0x50] sm:$0xff]  ;;  %v243_v60 = vld [vmem:[%s1398_s27 + $0x88] sm:$0xff] }
  0x1f   : > { %1119 = vmatpush3.msra.mxu1 %v313_v26  ;;  %1009 = vmatpush3.msra.mxu0 %v280_v28  ;;  %v234_v54 = vld [vmem:[%s1398_s27 + $0x40] sm:$0xff]  ;;  %v235_v61 = vld [vmem:[%s1398_s27 + $0x48] sm:$0xff]  ;;  %v249_v0 = vld [vmem:[%s1398_s27 + $0xb8] sm:$0xff] }
  0x20   : > { %1120 = vmatprep.subr.mxu1 %v312_v29  ;;  %1010 = vmatprep.subr.mxu0 %v295_v30  ;;  %v246_v62 = vld [vmem:[%s1398_s27 + $0xa0] sm:$0xff]  ;;  %v239_v63 = vld [vmem:[%s1398_s27 + $0x68] sm:$0xff]  ;;  %v252_v2 = vld [vmem:[%s1398_s27 + $0xd0] sm:$0xff] }
  0x21   : > { %1121 = vmatpush3.msra.mxu1 %v312_v29  ;;  %1011 = vmatpush3.msra.mxu0 %v279_v31  ;;  %v238_v1 = vld [vmem:[%s1398_s27 + $0x60] sm:$0xff]  ;;  %v255_v4 = vld [vmem:[%s1398_s27 + $0xe8] sm:$0xff]  ;;  %v241_v5 = vld [vmem:[%s1398_s27 + $0x78] sm:$0xff] }
  0x22   : > { %1122 = vmatprep.subr.mxu1 %v311_v32  ;;  %1012 = vmatprep.subr.mxu0 %v294_v33  ;;  %v242_v3 = vld [vmem:[%s1398_s27 + $0x80] sm:$0xff]  ;;  %v245_v7 = vld [vmem:[%s1398_s27 + $0x98] sm:$0xff]  ;;  %v244_v9 = vld [vmem:[%s1398_s27 + $0x90] sm:$0xff] }
  0x23   : > { %1123 = vmatpush3.msra.mxu1 %v311_v32  ;;  %1013 = vmatpush3.msra.mxu0 %v278_v34  ;;  %v258_v6 = vld [vmem:[%s1398_s27 + $0x100] sm:$0xff]  ;;  %v261_v8 = vld [vmem:[%s1398_s27 + $0x118] sm:$0xff]  ;;  %v264_v10 = vld [vmem:[%s1398_s27 + $0x130] sm:$0xff] }
  0x24   : > { %1124 = vmatprep.subr.mxu1 %v310_v35  ;;  %1014 = vmatprep.subr.mxu0 %v293_v36  ;;  %v248_v11 = vld [vmem:[%s1398_s27 + $0xb0] sm:$0xff]  ;;  %v267_v12 = vld [vmem:[%s1398_s27 + $0x148] sm:$0xff]  ;;  %v270_v14 = vld [vmem:[%s1398_s27 + $0x160] sm:$0xff] }
  0x25   : > { %1125 = vmatpush3.msra.mxu1 %v310_v35  ;;  %1015 = vmatpush3.msra.mxu0 %v277_v37  ;;  %v247_v13 = vld [vmem:[%s1398_s27 + $0xa8] sm:$0xff]  ;;  %v273_v16 = vld [vmem:[%s1398_s27 + $0x178] sm:$0xff]  ;;  %v250_v17 = vld [vmem:[%s1398_s27 + $0xc0] sm:$0xff] }
  0x26   : > { %1126 = vmatprep.subr.mxu1 %v309_v38  ;;  %1016 = vmatprep.subr.mxu0 %v292_v39  ;;  %v251_v15 = vld [vmem:[%s1398_s27 + $0xc8] sm:$0xff]  ;;  %v254_v18 = vld [vmem:[%s1398_s27 + $0xe0] sm:$0xff]  ;;  %v253_v19 = vld [vmem:[%s1398_s27 + $0xd8] sm:$0xff] }
  0x27   : > { %1127 = vmatpush3.msra.mxu1 %v309_v38  ;;  %1017 = vmatpush3.msra.mxu0 %v276_v40  ;;  %v257_v20 = vld [vmem:[%s1398_s27 + $0xf8] sm:$0xff]  ;;  %v256_v21 = vld [vmem:[%s1398_s27 + $0xf0] sm:$0xff]  ;;  %v259_v23 = vld [vmem:[%s1398_s27 + $0x108] sm:$0xff] }
  0x28   : > { %1128 = vmatprep.subr.mxu1 %v308_v41  ;;  %1018 = vmatprep.subr.mxu0 %v291_v42  ;;  %v260_v22 = vld [vmem:[%s1398_s27 + $0x110] sm:$0xff]  ;;  %v263_v24 = vld [vmem:[%s1398_s27 + $0x128] sm:$0xff]  ;;  %v262_v25 = vld [vmem:[%s1398_s27 + $0x120] sm:$0xff] }
  0x29   : > { %393 = vmatprep.mubr.f32.mxu0 %v227_v43  ;;  %1019 = vmatpush3.msra.mxu0 %v275_v44  ;;  %v266_v26 = vld [vmem:[%s1398_s27 + $0x140] sm:$0xff]  ;;  %v265_v27 = vld [vmem:[%s1398_s27 + $0x138] sm:$0xff]  ;;  %v268_v29 = vld [vmem:[%s1398_s27 + $0x150] sm:$0xff] }
  0x2a   : > { %1129 = vmatpush3.msra.mxu1 %v308_v41  ;;  %1020 = vmatprep.subr.mxu0 %v290_v45  ;;  %v269_v28 = vld [vmem:[%s1398_s27 + $0x158] sm:$0xff]  ;;  %v272_v30 = vld [vmem:[%s1398_s27 + $0x170] sm:$0xff]  ;;  %v271_v31 = vld [vmem:[%s1398_s27 + $0x168] sm:$0xff]  ;;  %s1591_s27 = scalar_lea.vmem %s1746_s0, %s982_s23 }
  0x2b   : > { %1130 = vmatprep.subr.mxu1 %v307_v46  ;;  %1021 = vmatpush3.msra.mxu0 %v274_v47  ;;  %v1478_v34 = vld [vmem:[%s1749_s3] ss:$0 sm:$0xff] }
  0x2c   : > { %1131 = vmatpush3.msra.mxu1 %v307_v46  ;;  %394 = vmatmul.mubr.f32.vlgmr.msra.gmra.mxu0 %v226_v48 }
  0x2d   : > { %1132 = vmatprep.subr.mxu1 %v306_v49  ;;  %398 = vmatprep.mubr.f32.mxu0 %v230_v50 }
  0x2e   : > { %1133 = vmatpush3.msra.mxu1 %v306_v49  ;;  %1134 = vmatprep.mubr.f32.mxu1 %v228_v51 }
  0x2f   : > { %1135 = vmatmul.mubr.f32.vlgmr.msra.gmra.mxu1 %v231_v52 }
  0x30   : > { %399 = vmatmul.mubr.f32.gmra.mxu0 %v229_v53  ;;  %1137 = vmatprep.mubr.f32.mxu1 %v234_v54 }
  0x31   : > { %403 = vmatprep.mubr.f32.mxu0 %v233_v55 }
  0x33   : > { %1138 = vmatmul.mubr.f32.gmra.mxu1 %v237_v56 }
  0x34   : > { %404 = vmatmul.mubr.f32.gmra.mxu0 %v232_v57  ;;  %1140 = vmatprep.mubr.f32.mxu1 %v240_v58 }
  0x35   : > { %408 = vmatprep.mubr.f32.mxu0 %v236_v59 }
  0x37   : > { %1141 = vmatmul.mubr.f32.gmra.mxu1 %v243_v60 }
  0x38   : > { %409 = vmatmul.mubr.f32.gmra.mxu0 %v235_v61  ;;  %1143 = vmatprep.mubr.f32.mxu1 %v246_v62 }
  0x39   : > { %413 = vmatprep.mubr.f32.mxu0 %v239_v63 }
  0x3b   : > { %1144 = vmatmul.mubr.f32.gmra.mxu1 %v249_v0 }
  0x3c   : > { %414 = vmatmul.mubr.f32.gmra.mxu0 %v238_v1  ;;  %1146 = vmatprep.mubr.f32.mxu1 %v252_v2 }
  0x3d   : > { %418 = vmatprep.mubr.f32.mxu0 %v242_v3 }
  0x3f   : > { %1147 = vmatmul.mubr.f32.gmra.mxu1 %v255_v4 }
  0x40   : > { %419 = vmatmul.mubr.f32.gmra.mxu0 %v241_v5  ;;  %1149 = vmatprep.mubr.f32.mxu1 %v258_v6 }
  0x41   : > { %423 = vmatprep.mubr.f32.mxu0 %v245_v7 }
  0x43   : > { %1150 = vmatmul.mubr.f32.gmra.mxu1 %v261_v8 }
  0x44   : > { %424 = vmatmul.mubr.f32.gmra.mxu0 %v244_v9  ;;  %1152 = vmatprep.mubr.f32.mxu1 %v264_v10 }
  0x45   : > { %428 = vmatprep.mubr.f32.mxu0 %v248_v11 }
  0x47   : > { %1153 = vmatmul.mubr.f32.gmra.mxu1 %v267_v12 }
  0x48   : > { %429 = vmatmul.mubr.f32.gmra.mxu0 %v247_v13  ;;  %1155 = vmatprep.mubr.f32.mxu1 %v270_v14 }
  0x49   : > { %433 = vmatprep.mubr.f32.mxu0 %v251_v15 }
  0x4b   : > { %1156 = vmatmul.mubr.f32.gmra.mxu1 %v273_v16 }
  0x4c   : > { %434 = vmatmul.mubr.f32.gmra.mxu0 %v250_v17 }
  0x4d   : > { %438 = vmatprep.mubr.f32.mxu0 %v254_v18 }
  0x50   : > { %439 = vmatmul.mubr.f32.gmra.mxu0 %v253_v19 }
  0x51   : > { %443 = vmatprep.mubr.f32.mxu0 %v257_v20 }
  0x54   : > { %444 = vmatmul.mubr.f32.gmra.mxu0 %v256_v21 }
  0x55   : > { %448 = vmatprep.mubr.f32.mxu0 %v260_v22 }
  0x58   : > { %449 = vmatmul.mubr.f32.gmra.mxu0 %v259_v23 }
  0x59   : > { %453 = vmatprep.mubr.f32.mxu0 %v263_v24 }
  0x5c   : > { %454 = vmatmul.mubr.f32.gmra.mxu0 %v262_v25 }
  0x5d   : > { %458 = vmatprep.mubr.f32.mxu0 %v266_v26 }
  0x60   : > { %459 = vmatmul.mubr.f32.gmra.mxu0 %v265_v27 }
  0x61   : > { %463 = vmatprep.mubr.f32.mxu0 %v269_v28 }
  0x64   : > { %464 = vmatmul.mubr.f32.gmra.mxu0 %v268_v29 }
  0x65   : > { %468 = vmatprep.mubr.f32.mxu0 %v272_v30 }
  0x68   : > { %469 = vmatmul.mubr.f32.gmra.mxu0 %v271_v31 }
  0xec   : > { %v1022_v32 = vpop.f32.mrf.mxu0 }
  0xee   : > { %v1023_v33 = vpop.f32.mrf.mxu0 }
  0xef   : > { %v1024_v35 = vadd.f32 %v1023_v33, %v1022_v32  ;;  %v1136_v36 = vpop.f32.mrf.mxu1 }
  0xf0   : > { %v1025_v37 = vpop.f32.mrf.mxu0 }
  0xf1   : > { %v396_v38 = vadd.f32 %v1024_v35, %v1478_v34  ;;  %v540_v39 = vpop.f32.mrf.mxu1 }
  0xf2   : > { %v1026_v40 = vpop.f32.mrf.mxu0 }
  0xf3   : > { %v1027_v41 = vadd.f32 %v1026_v40, %v1025_v37  ;;  %v1481_v42 = vadd.f32 %v540_v39, %v396_v38  ;;  %v1139_v44 = vpop.f32.mrf.mxu1 }
  0xf4   : > { %v1028_v43 = vpop.f32.mrf.mxu0 }
  0xf5   : > { %v401_v45 = vadd.f32 %v1027_v41, %v1478_v34  ;;  %v619_v46 = vmul.f32 %v1481_v42, %v1481_v42  ;;  %v550_v52 = vpop.f32.mrf.mxu1 }
  0xf6   : > { %v1029_v47 = vpop.f32.mrf.mxu0 }
  0xf7   : > { %v1030_v48 = vadd.f32 %v1029_v47, %v1028_v43  ;;  %v636_v49 = vsel %vm635_vm0, %v619_v46, 0.0  ;;  %v1487_v50 = vadd.f32 %v1136_v36, %v401_v45  ;;  %v1142_v60 = vpop.f32.mrf.mxu1 }
  0xf8   : > { %v1031_v51 = vpop.f32.mrf.mxu0  ;;  %637 = vadd.xlane.f32.xlu0 %v636_v49 }
  0xf9   : > { %v406_v53 = vadd.f32 %v1030_v48, %v1478_v34  ;;  %v620_v54 = vmul.f32 %v1487_v50, %v1487_v50  ;;  %v560_v4 = vpop.f32.mrf.mxu1 }
  0xfa   : > { %v1032_v55 = vpop.f32.mrf.mxu0 }
  0xfb   : > { %v1033_v56 = vadd.f32 %v1032_v55, %v1031_v51  ;;  %v1492_v57 = vadd.f32 %v550_v52, %v406_v53  ;;  %v639_v58 = vsel %vm635_vm0, %v620_v54, 0.0  ;;  %v1145_v12 = vpop.f32.mrf.mxu1 }
  0xfc   : > { %v1034_v59 = vpop.f32.mrf.mxu0  ;;  %640 = vadd.xlane.f32.xlu0 %v639_v58 }
  0xfd   : > { %v411_v61 = vadd.f32 %v1033_v56, %v1478_v34  ;;  %v621_v62 = vmul.f32 %v1492_v57, %v1492_v57  ;;  %v570_v20 = vpop.f32.mrf.mxu1 }
  0xfe   : > { %v1035_v63 = vpop.f32.mrf.mxu0 }
  0xff   : > { %v1036_v0 = vadd.f32 %v1035_v63, %v1034_v59  ;;  %v642_v1 = vsel %vm635_vm0, %v621_v62, 0.0  ;;  %v1499_v2 = vadd.f32 %v1139_v44, %v411_v61  ;;  %v1148_v28 = vpop.f32.mrf.mxu1 }
 0x100   : > { %v1037_v3 = vpop.f32.mrf.mxu0  ;;  %643 = vadd.xlane.f32.xlu1 %v642_v1 }
 0x101   : > { %v416_v5 = vadd.f32 %v1036_v0, %v1478_v34  ;;  %v622_v6 = vmul.f32 %v1499_v2, %v1499_v2  ;;  %v580_v37 = vpop.f32.mrf.mxu1 }
 0x102   : > { %v1038_v7 = vpop.f32.mrf.mxu0 }
 0x103   : > { %v1039_v8 = vadd.f32 %v1038_v7, %v1037_v3  ;;  %v1504_v9 = vadd.f32 %v560_v4, %v416_v5  ;;  %v645_v10 = vsel %vm635_vm0, %v622_v6, 0.0  ;;  %v1151_v46 = vpop.f32.mrf.mxu1 }
 0x104   : > { %v1040_v11 = vpop.f32.mrf.mxu0  ;;  %646 = vadd.xlane.f32.xlu1 %v645_v10 }
 0x105   : > { %v421_v13 = vadd.f32 %v1039_v8, %v1478_v34  ;;  %v623_v14 = vmul.f32 %v1504_v9, %v1504_v9  ;;  %v590_v55 = vpop.f32.mrf.mxu1 }
 0x106   : > { %v1041_v15 = vpop.f32.mrf.mxu0 }
 0x107   : > { %v1042_v16 = vadd.f32 %v1041_v15, %v1040_v11  ;;  %v648_v17 = vsel %vm635_vm0, %v623_v14, 0.0  ;;  %v1511_v18 = vadd.f32 %v1142_v60, %v421_v13  ;;  %v1154_v0 = vpop.f32.mrf.mxu1 }
 0x108   : > { %v1043_v19 = vpop.f32.mrf.mxu0  ;;  %649 = vadd.xlane.f32.xlu0 %v648_v17 }
 0x109   : > { %v426_v21 = vadd.f32 %v1042_v16, %v1478_v34  ;;  %v624_v22 = vmul.f32 %v1511_v18, %v1511_v18  ;;  %v600_v10 = vpop.f32.mrf.mxu1 }
 0x10a   : > { %v1044_v23 = vpop.f32.mrf.mxu0 }
 0x10b   : > { %v1045_v24 = vadd.f32 %v1044_v23, %v1043_v19  ;;  %v1516_v25 = vadd.f32 %v570_v20, %v426_v21  ;;  %v651_v26 = vsel %vm635_vm0, %v624_v22, 0.0  ;;  %v1157_v19 = vpop.f32.mrf.mxu1 }
 0x10c   : > { %v1046_v27 = vpop.f32.mrf.mxu0  ;;  %652 = vadd.xlane.f32.xlu1 %v651_v26 }
 0x10d   : > { %v431_v29 = vadd.f32 %v1045_v24, %v1478_v34  ;;  %v625_v30 = vmul.f32 %v1516_v25, %v1516_v25 }
 0x10e   : > { %v1047_v31 = vpop.f32.mrf.mxu0 }
 0x10f   : > { %v1048_v32 = vadd.f32 %v1047_v31, %v1046_v27  ;;  %v654_v33 = vsel %vm635_vm0, %v625_v30, 0.0  ;;  %v1523_v35 = vadd.f32 %v1145_v12, %v431_v29 }
 0x110   : > { %v1049_v36 = vpop.f32.mrf.mxu0  ;;  %655 = vadd.xlane.f32.xlu0 %v654_v33 }
 0x111   : > { %v436_v38 = vadd.f32 %v1048_v32, %v1478_v34  ;;  %v626_v39 = vmul.f32 %v1523_v35, %v1523_v35 }
 0x112   : > { %v1050_v40 = vpop.f32.mrf.mxu0 }
 0x113   : > { %v1051_v41 = vadd.f32 %v1050_v40, %v1049_v36  ;;  %v1528_v43 = vadd.f32 %v580_v37, %v436_v38  ;;  %v657_v44 = vsel %vm635_vm0, %v626_v39, 0.0 }
 0x114   : > { %v1052_v45 = vpop.f32.mrf.mxu0  ;;  %658 = vadd.xlane.f32.xlu1 %v657_v44 }
 0x115   : > { %v441_v47 = vadd.f32 %v1051_v41, %v1478_v34  ;;  %v627_v48 = vmul.f32 %v1528_v43, %v1528_v43 }
 0x116   : > { %v1053_v49 = vpop.f32.mrf.mxu0 }
 0x117   : > { %v1054_v51 = vadd.f32 %v1053_v49, %v1052_v45  ;;  %v660_v52 = vsel %vm635_vm0, %v627_v48, 0.0  ;;  %v1535_v53 = vadd.f32 %v1148_v28, %v441_v47  ;;  %v610_v28 = vpop.f32.mrf.mxu1 }
 0x118   : > { %v1055_v54 = vpop.f32.mrf.mxu0  ;;  %661 = vadd.xlane.f32.xlu0 %v660_v52 }
 0x119   : > { %v446_v56 = vadd.f32 %v1054_v51, %v1478_v34  ;;  %v628_v58 = vmul.f32 %v1535_v53, %v1535_v53 }
 0x11a   : > { %v1056_v59 = vpop.f32.mrf.mxu0 }
 0x11b   : > { %v1057_v60 = vadd.f32 %v1056_v59, %v1055_v54  ;;  %v1540_v61 = vadd.f32 %v590_v55, %v446_v56  ;;  %v663_v62 = vsel %vm635_vm0, %v628_v58, 0.0 }
 0x11c   : > { %v1058_v63 = vpop.f32.mrf.mxu0  ;;  %664 = vadd.xlane.f32.xlu1 %v663_v62 }
 0x11d   : > { %v451_v1 = vadd.f32 %v1057_v60, %v1478_v34  ;;  %v629_v3 = vmul.f32 %v1540_v61, %v1540_v61 }
 0x11e   : > { %v1059_v4 = vpop.f32.mrf.mxu0 }
 0x11f   : > { %v1060_v5 = vadd.f32 %v1059_v4, %v1058_v63  ;;  %v666_v6 = vsel %vm635_vm0, %v629_v3, 0.0  ;;  %v1547_v7 = vadd.f32 %v1151_v46, %v451_v1 }
 0x120   : > { %v1061_v8 = vpop.f32.mrf.mxu0  ;;  %667 = vadd.xlane.f32.xlu0 %v666_v6 }
 0x121   : > { %v456_v11 = vadd.f32 %v1060_v5, %v1478_v34  ;;  %v630_v12 = vmul.f32 %v1547_v7, %v1547_v7 }
 0x122   : > { %v1062_v13 = vpop.f32.mrf.mxu0 }
 0x123   : > { %v1063_v14 = vadd.f32 %v1062_v13, %v1061_v8  ;;  %v1552_v15 = vadd.f32 %v600_v10, %v456_v11  ;;  %v669_v16 = vsel %vm635_vm0, %v630_v12, 0.0 }
 0x124   : > { %v1064_v17 = vpop.f32.mrf.mxu0  ;;  %670 = vadd.xlane.f32.xlu1 %v669_v16 }
 0x125   : > { %v461_v20 = vadd.f32 %v1063_v14, %v1478_v34  ;;  %v631_v21 = vmul.f32 %v1552_v15, %v1552_v15 }
 0x126   : > { %v1065_v22 = vpop.f32.mrf.mxu0 }
 0x127   : > { %v1066_v23 = vadd.f32 %v1065_v22, %v1064_v17  ;;  %v672_v24 = vsel %vm635_vm0, %v631_v21, 0.0  ;;  %v1559_v26 = vadd.f32 %v1154_v0, %v461_v20 }
 0x128   : > { %v1067_v27 = vpop.f32.mrf.mxu0  ;;  %673 = vadd.xlane.f32.xlu0 %v672_v24 }
 0x129   : > { %v466_v29 = vadd.f32 %v1066_v23, %v1478_v34  ;;  %v632_v30 = vmul.f32 %v1559_v26, %v1559_v26 }
 0x12a   : > { %v1068_v31 = vpop.f32.mrf.mxu0 }
 0x12b   : > { %v1069_v32 = vadd.f32 %v1068_v31, %v1067_v27  ;;  %v1564_v33 = vadd.f32 %v610_v28, %v466_v29  ;;  %v675_v36 = vsel %vm635_vm0, %v632_v30, 0.0  ;;  %v844_v29 = vld [vmem:[%s1591_s27] sm:$0xff] }
 0x12c   : > { %676 = vadd.xlane.f32.xlu1 %v675_v36 }
 0x12d   : > { %v471_v37 = vadd.f32 %v1069_v32, %v1478_v34  ;;  %v633_v38 = vmul.f32 %v1564_v33, %v1564_v33 }
 0x12f   : > { %v678_v39 = vsel %vm635_vm0, %v633_v38, 0.0  ;;  %v1571_v40 = vadd.f32 %v1157_v19, %v471_v37 }
 0x130   : > { %679 = vadd.xlane.f32.xlu0 %v678_v39 }
 0x131   : > { %v634_v41 = vmul.f32 %v1571_v40, %v1571_v40 }
 0x133   : > { %v681_v44 = vsel %vm635_vm0, %v634_v41, 0.0 }
 0x134   : > { %682 = vadd.xlane.f32.xlu1 %v681_v44 }
 0x181   : > { %v638_v45 = vpop.xlane.xlu0 %637 }
 0x182   : > { %1167 = vrsqrt.f32 %v638_v45  ;;  %vm686_vm1 = vcmp.eq.f32.partialorder %v638_v45, inf  ;;  %v689_v51 = vand.u32 2147483648, %v638_v45  ;;  %vm688_vm2 = vcmp.eq.f32.partialorder %v638_v45, 0.0 }
 0x185   : > { %v641_v46 = vpop.xlane.xlu0 %640 }
 0x186   : > { %1169 = vrsqrt.f32 %v641_v46  ;;  %vm693_vm3 = vcmp.eq.f32.partialorder %v641_v46, inf  ;;  %v696_v60 = vand.u32 2147483648, %v641_v46  ;;  %vm695_vm4 = vcmp.eq.f32.partialorder %v641_v46, 0.0 }
 0x189   : > { %v644_v47 = vpop.xlane.xlu1 %643 }
 0x18a   : > { %1171 = vrsqrt.f32 %v644_v47  ;;  %vm700_vm5 = vcmp.eq.f32.partialorder %v644_v47, inf  ;;  %v703_v5 = vand.u32 2147483648, %v644_v47  ;;  %vm702_vm6 = vcmp.eq.f32.partialorder %v644_v47, 0.0 }
 0x18d   : > { %v647_v34 = vpop.xlane.xlu1 %646 }
 0x18e   : > { %1173 = vrsqrt.f32 %v647_v34  ;;  %vm707_vm7 = vcmp.eq.f32.partialorder %v647_v34, inf  ;;  %v710_v14 = vand.u32 2147483648, %v647_v34  ;;  %vm709_vm8 = vcmp.eq.f32.partialorder %v647_v34, 0.0 }
 0x18f   : > { %v1168_v48 = vpop.eup %1167 }
 0x190   : > { %v685_v49 = vmul.f32 %v1168_v48, %v638_v45 }
 0x191   : > { %v650_v52 = vpop.xlane.xlu0 %649 }
 0x192   : > { %v687_v54 = vsel %vm686_vm1, %v638_v45, %v685_v49  ;;  %1175 = vrsqrt.f32 %v650_v52  ;;  %vm714_vm9 = vcmp.eq.f32.partialorder %v650_v52, inf  ;;  %v717_v23 = vand.u32 2147483648, %v650_v52 }
 0x193   : > { %v1170_v55 = vpop.eup %1169  ;;  %v690_v56 = vsel %vm688_vm2, %v689_v51, %v687_v54  ;;  %vm716_vm10 = vcmp.eq.f32.partialorder %v650_v52, 0.0 }
 0x194   : > { %v796_v58 = vmax.f32 %v690_v56, 1e-12  ;;  %v692_v59 = vmul.f32 %v1170_v55, %v641_v46 }
 0x195   : > { %v1576_v62 = vpop.xlane.xlu1 %652 }
 0x196   : > { %1177 = vrcp.f32 %v796_v58  ;;  %v694_v63 = vsel %vm693_vm3, %v641_v46, %v692_v59  ;;  %vm721_vm11 = vcmp.eq.f32.partialorder %v1576_v62, inf  ;;  %v724_v41 = vand.u32 2147483648, %v1576_v62  ;;  %v846_v58 = vld [vmem:[%s1591_s27 + $0x10] sm:$0xff] }
 0x197   : > { %v1172_v0 = vpop.eup %1171  ;;  %v697_v1 = vsel %vm695_vm4, %v696_v60, %v694_v63  ;;  %1179 = vrsqrt.f32 %v1576_v62  ;;  %vm723_vm12 = vcmp.eq.f32.partialorder %v1576_v62, 0.0 }
 0x198   : > { %v797_v3 = vmax.f32 %v697_v1, 1e-12  ;;  %v699_v4 = vmul.f32 %v1172_v0, %v644_v47 }
 0x199   : > { %v1579_v6 = vpop.xlane.xlu0 %655 }
 0x19a   : > { %1181 = vrcp.f32 %v797_v3  ;;  %v701_v8 = vsel %vm700_vm5, %v644_v47, %v699_v4  ;;  %vm728_vm13 = vcmp.eq.f32.partialorder %v1579_v6, inf  ;;  %v731_v55 = vand.u32 2147483648, %v1579_v6 }
 0x19b   : > { %v1174_v10 = vpop.eup %1173  ;;  %v704_v11 = vsel %vm702_vm6, %v703_v5, %v701_v8  ;;  %1183 = vrsqrt.f32 %v1579_v6  ;;  %vm730_vm14 = vcmp.eq.f32.partialorder %v1579_v6, 0.0  ;;  %v847_v8 = vld [vmem:[%s1591_s27 + $0x18] sm:$0xff] }
 0x19c   : > { %v798_v12 = vmax.f32 %v704_v11, 1e-12  ;;  %v706_v13 = vmul.f32 %v1174_v10, %v647_v34 }
 0x19d   : > { %v1583_v16 = vpop.xlane.xlu1 %658 }
 0x19e   : > { %1185 = vrcp.f32 %v798_v12  ;;  %v708_v17 = vsel %vm707_vm7, %v647_v34, %v706_v13  ;;  %vm735_vm15 = vcmp.eq.f32.partialorder %v1583_v16, inf  ;;  %v738_v5 = vand.u32 2147483648, %v1583_v16 }
 0x19f   : > { %v1176_v19 = vpop.eup %1175  ;;  %v711_v20 = vsel %vm709_vm8, %v710_v14, %v708_v17  ;;  %1187 = vrsqrt.f32 %v1583_v16  ;;  %vm737_vm1 = vcmp.eq.f32.partialorder %v1583_v16, 0.0 }
 0x1a0   : > { %v799_v21 = vmax.f32 %v711_v20, 1e-12  ;;  %v713_v22 = vmul.f32 %v1176_v19, %v650_v52 }
 0x1a1   : > { %v1593_v24 = vpop.xlane.xlu0 %661 }
 0x1a2   : > { %1189 = vrcp.f32 %v799_v21  ;;  %v715_v27 = vsel %vm714_vm9, %v650_v52, %v713_v22  ;;  %vm742_vm2 = vcmp.eq.f32.partialorder %v1593_v24, inf  ;;  %v745_v21 = vand.u32 2147483648, %v1593_v24  ;;  %v848_v22 = vld [vmem:[%s1591_s27 + $0x20] sm:$0xff] }
 0x1a3   : > { %v1178_v28 = vpop.eup %1177  ;;  %v718_v30 = vsel %vm716_vm10, %v717_v23, %v715_v27  ;;  %1191 = vrsqrt.f32 %v1593_v24  ;;  %vm744_vm3 = vcmp.eq.f32.partialorder %v1593_v24, 0.0 }
 0x1a4   : > { %v1180_v31 = vpop.eup %1179  ;;  %v813_v32 = vmul.f32 %v1178_v28, %v1481_v42  ;;  %v800_v36 = vmax.f32 %v718_v30, 1e-12  ;;  %v845_v42 = vld [vmem:[%s1591_s27 + $0x8] sm:$0xff] }
 0x1a5   : > { %v720_v37 = vmul.f32 %v1180_v31, %v1576_v62  ;;  %v1599_v38 = vpop.xlane.xlu1 %664 }
 0x1a6   : > { %v860_v39 = vadd.f32 %v844_v29, %v813_v32  ;;  %1193 = vrcp.f32 %v800_v36  ;;  %vm749_vm4 = vcmp.eq.f32.partialorder %v1599_v38, inf  ;;  %vm751_vm5 = vcmp.eq.f32.partialorder %v1599_v38, 0.0 }
 0x1a7   : > { %v1182_v44 = vpop.eup %1181  ;;  %v722_v45 = vsel %vm721_vm11, %v1576_v62, %v720_v37  ;;  %1195 = vrsqrt.f32 %v1599_v38  ;;  %v752_v37 = vand.u32 2147483648, %v1599_v38 }
 0x1a8   : > { %v1184_v46 = vpop.eup %1183  ;;  %v876_v47 = vmul.f32 0.5, %v860_v39  ;;  %v815_v34 = vmul.f32 %v1182_v44, %v1487_v50  ;;  %v725_v48 = vsel %vm723_vm12, %v724_v41, %v722_v45  ;;  %v849_v44 = vld [vmem:[%s1591_s27 + $0x28] sm:$0xff] }
 0x1a9   : > { %v801_v49 = vmax.f32 %v725_v48, 1e-12  ;;  %v727_v51 = vmul.f32 %v1184_v46, %v1579_v6  ;;  %v1616_v52 = vpop.xlane.xlu0 %667 }
 0x1aa   : > { %892 = vst.msk [vmem:[%s1608_s30] sm:$0xff] %vm635_vm0, %v876_v47  ;;  %v861_v54 = vadd.f32 %v845_v42, %v815_v34  ;;  %1197 = vrsqrt.f32 %v1616_v52  ;;  %vm756_vm6 = vcmp.eq.f32.partialorder %v1616_v52, inf  ;;  %v759_v34 = vand.u32 2147483648, %v1616_v52 }
 0x1ab   : > { %v1186_v56 = vpop.eup %1185  ;;  %1199 = vrcp.f32 %v801_v49  ;;  %v729_v50 = vsel %vm728_vm13, %v1579_v6, %v727_v51  ;;  %vm758_vm7 = vcmp.eq.f32.partialorder %v1616_v52, 0.0 }
 0x1ac   : > { %v1188_v59 = vpop.eup %1187  ;;  %v877_v60 = vmul.f32 0.5, %v861_v54  ;;  %v817_v62 = vmul.f32 %v1186_v56, %v1492_v57  ;;  %v732_v63 = vsel %vm730_vm14, %v731_v55, %v729_v50  ;;  %v850_v55 = vld [vmem:[%s1591_s27 + $0x30] sm:$0xff] }
 0x1ad   : > { %v802_v0 = vmax.f32 %v732_v63, 1e-12  ;;  %v734_v1 = vmul.f32 %v1188_v59, %v1583_v16  ;;  %v1628_v3 = vpop.xlane.xlu1 %670 }
 0x1ae   : > { %893 = vst.msk [vmem:[%s1608_s30 + $0x8] sm:$0xff] %vm635_vm0, %v877_v60  ;;  %v862_v4 = vadd.f32 %v846_v58, %v817_v62  ;;  %1201 = vrsqrt.f32 %v1628_v3  ;;  %vm763_vm8 = vcmp.eq.f32.partialorder %v1628_v3, inf  ;;  %vm765_vm9 = vcmp.eq.f32.partialorder %v1628_v3, 0.0 }
 0x1af   : > { %v1190_v6 = vpop.eup %1189  ;;  %1203 = vrcp.f32 %v802_v0  ;;  %v736_v57 = vsel %vm735_vm15, %v1583_v16, %v734_v1 }
 0x1b0   : > { %v1192_v10 = vpop.eup %1191  ;;  %v878_v11 = vmul.f32 0.5, %v862_v4  ;;  %v819_v12 = vmul.f32 %v1190_v6, %v1499_v2  ;;  %v739_v13 = vsel %vm737_vm1, %v738_v5, %v736_v57  ;;  %v851_v4 = vld [vmem:[%s1591_s27 + $0x38] sm:$0xff] }
 0x1b1   : > { %v803_v14 = vmax.f32 %v739_v13, 1e-12  ;;  %v741_v17 = vmul.f32 %v1192_v10, %v1593_v24  ;;  %v1640_v19 = vpop.xlane.xlu0 %673 }
 0x1b2   : > { %894 = vst.msk [vmem:[%s1608_s30 + $0x10] sm:$0xff] %vm635_vm0, %v878_v11  ;;  %v863_v20 = vadd.f32 %v847_v8, %v819_v12  ;;  %1205 = vrsqrt.f32 %v1640_v19  ;;  %vm770_vm10 = vcmp.eq.f32.partialorder %v1640_v19, inf  ;;  %vm772_vm11 = vcmp.eq.f32.partialorder %v1640_v19, 0.0 }
 0x1b3   : > { %v1194_v16 = vpop.eup %1193  ;;  %1207 = vrcp.f32 %v803_v14  ;;  %v743_v2 = vsel %vm742_vm2, %v1593_v24, %v741_v17  ;;  %v852_v17 = vld [vmem:[%s1591_s27 + $0x40] sm:$0xff] }
 0x1b4   : > { %v1196_v23 = vpop.eup %1195  ;;  %v879_v27 = vmul.f32 0.5, %v863_v20  ;;  %v821_v28 = vmul.f32 %v1194_v16, %v1504_v9  ;;  %v746_v29 = vsel %vm744_vm3, %v745_v21, %v743_v2 }
 0x1b5   : > { %v804_v30 = vmax.f32 %v746_v29, 1e-12  ;;  %v748_v31 = vmul.f32 %v1196_v23, %v1599_v38  ;;  %v1652_v32 = vpop.xlane.xlu1 %676  ;;  %v853_v29 = vld [vmem:[%s1591_s27 + $0x48] sm:$0xff] }
 0x1b6   : > { %895 = vst.msk [vmem:[%s1608_s30 + $0x18] sm:$0xff] %vm635_vm0, %v879_v27  ;;  %v864_v36 = vadd.f32 %v848_v22, %v821_v28  ;;  %1209 = vrsqrt.f32 %v1652_v32  ;;  %vm777_vm12 = vcmp.eq.f32.partialorder %v1652_v32, inf  ;;  %v780_v22 = vand.u32 2147483648, %v1652_v32 }
 0x1b7   : > { %v1198_v24 = vpop.eup %1197  ;;  %1211 = vrcp.f32 %v804_v30  ;;  %v750_v9 = vsel %vm749_vm4, %v1599_v38, %v748_v31  ;;  %vm779_vm13 = vcmp.eq.f32.partialorder %v1652_v32, 0.0 }
 0x1b8   : > { %v1200_v39 = vpop.eup %1199  ;;  %v880_v41 = vmul.f32 0.5, %v864_v36  ;;  %v753_v42 = vsel %vm751_vm5, %v752_v37, %v750_v9  ;;  %v755_v45 = vmul.f32 %v1198_v24, %v1616_v52 }
 0x1b9   : > { %v823_v46 = vmul.f32 %v1200_v39, %v1511_v18  ;;  %v805_v47 = vmax.f32 %v753_v42, 1e-12  ;;  %v1666_v48 = vpop.xlane.xlu0 %679  ;;  %v854_v39 = vld [vmem:[%s1591_s27 + $0x50] sm:$0xff] }
 0x1ba   : > { %896 = vst.msk [vmem:[%s1608_s30 + $0x20] sm:$0xff] %vm635_vm0, %v880_v41  ;;  %v757_v38 = vsel %vm756_vm6, %v1616_v52, %v755_v45  ;;  %1213 = vrsqrt.f32 %v1666_v48  ;;  %v766_v52 = vand.u32 2147483648, %v1628_v3  ;;  %vm784_vm14 = vcmp.eq.f32.partialorder %v1666_v48, inf }
 0x1bb   : > { %v1202_v49 = vpop.eup %1201  ;;  %v865_v51 = vadd.f32 %v849_v44, %v823_v46  ;;  %1215 = vrcp.f32 %v805_v47  ;;  %v760_v18 = vsel %vm758_vm7, %v759_v34, %v757_v38  ;;  %v787_v37 = vand.u32 2147483648, %v1666_v48  ;;  %v855_v38 = vld [vmem:[%s1591_s27 + $0x58] sm:$0xff] }
 0x1bc   : > { %v1204_v54 = vpop.eup %1203  ;;  %v806_v56 = vmax.f32 %v760_v18, 1e-12  ;;  %v762_v58 = vmul.f32 %v1202_v49, %v1628_v3  ;;  %vm786_vm15 = vcmp.eq.f32.partialorder %v1666_v48, 0.0 }
 0x1bd   : > { %v881_v50 = vmul.f32 0.5, %v865_v51  ;;  %v825_v59 = vmul.f32 %v1204_v54, %v1516_v25  ;;  %v1678_v60 = vpop.xlane.xlu1 %682 }
 0x1be   : > { %1217 = vrcp.f32 %v806_v56  ;;  %v764_v62 = vsel %vm763_vm8, %v1628_v3, %v762_v58  ;;  %v773_v3 = vand.u32 2147483648, %v1640_v19  ;;  %vm791_vm1 = vcmp.eq.f32.partialorder %v1678_v60, inf  ;;  %v856_v58 = vld [vmem:[%s1591_s27 + $0x60] sm:$0xff] }
 0x1bf   : > { %v1206_v63 = vpop.eup %1205  ;;  %897 = vst.msk [vmem:[%s1608_s30 + $0x28] sm:$0xff] %vm635_vm0, %v881_v50  ;;  %v866_v0 = vadd.f32 %v850_v55, %v825_v59  ;;  %v767_v1 = vsel %vm765_vm9, %v766_v52, %v764_v62  ;;  %1219 = vrsqrt.f32 %v1678_v60  ;;  %v794_v34 = vand.u32 2147483648, %v1678_v60 }
 0x1c0   : > { %v1208_v25 = vpop.eup %1207  ;;  %v807_v5 = vmax.f32 %v767_v1, 1e-12  ;;  %v769_v6 = vmul.f32 %v1206_v63, %v1640_v19  ;;  %vm793_vm2 = vcmp.eq.f32.partialorder %v1678_v60, 0.0 }
 0x1c1   : > { %v882_v8 = vmul.f32 0.5, %v866_v0  ;;  %v827_v57 = vmul.f32 %v1208_v25, %v1523_v35  ;;  %v858_v25 = vld [vmem:[%s1591_s27 + $0x70] sm:$0xff] }
 0x1c2   : > { %1221 = vrcp.f32 %v807_v5  ;;  %v771_v10 = vsel %vm770_vm10, %v1640_v19, %v769_v6 }
 0x1c3   : > { %v1210_v11 = vpop.eup %1209  ;;  %898 = vst.msk [vmem:[%s1608_s30 + $0x30] sm:$0xff] %vm635_vm0, %v882_v8  ;;  %v867_v12 = vadd.f32 %v851_v4, %v827_v57  ;;  %v774_v13 = vsel %vm772_vm11, %v773_v3, %v771_v10  ;;  %v859_v57 = vld [vmem:[%s1591_s27 + $0x78] sm:$0xff] }
 0x1c4   : > { %v1212_v14 = vpop.eup %1211  ;;  %v808_v20 = vmax.f32 %v774_v13, 1e-12  ;;  %v776_v35 = vmul.f32 %v1210_v11, %v1652_v32 }
 0x1c5   : > { %v883_v21 = vmul.f32 0.5, %v867_v12  ;;  %v829_v16 = vmul.f32 %v1212_v14, %v1528_v43 }
 0x1c6   : > { %1223 = vrcp.f32 %v808_v20  ;;  %v778_v19 = vsel %vm777_vm12, %v1652_v32, %v776_v35 }
 0x1c7   : > { %v1214_v2 = vpop.eup %1213  ;;  %899 = vst.msk [vmem:[%s1608_s30 + $0x38] sm:$0xff] %vm635_vm0, %v883_v21  ;;  %v868_v23 = vadd.f32 %v852_v17, %v829_v16  ;;  %v781_v27 = vsel %vm779_vm13, %v780_v22, %v778_v19 }
 0x1c8   : > { %v1216_v28 = vpop.eup %1215  ;;  %v809_v30 = vmax.f32 %v781_v27, 1e-12  ;;  %v783_v43 = vmul.f32 %v1214_v2, %v1666_v48 }
 0x1c9   : > { %v884_v31 = vmul.f32 0.5, %v868_v23  ;;  %v831_v36 = vmul.f32 %v1216_v28, %v1535_v53 }
 0x1ca   : > { %1225 = vrcp.f32 %v809_v30  ;;  %v785_v32 = vsel %vm784_vm14, %v1666_v48, %v783_v43 }
 0x1cb   : > { %v1218_v24 = vpop.eup %1217  ;;  %900 = vst.msk [vmem:[%s1608_s30 + $0x40] sm:$0xff] %vm635_vm0, %v884_v31  ;;  %v869_v9 = vadd.f32 %v853_v29, %v831_v36  ;;  %v788_v41 = vsel %vm786_vm15, %v787_v37, %v785_v32 }
 0x1cc   : > { %v1220_v44 = vpop.eup %1219  ;;  %v833_v53 = vmul.f32 %v1218_v24, %v1540_v61  ;;  %v810_v42 = vmax.f32 %v788_v41, 1e-12 }
 0x1cd   : > { %v885_v45 = vmul.f32 0.5, %v869_v9  ;;  %v790_v46 = vmul.f32 %v1220_v44, %v1678_v60 }
 0x1ce   : > { %v870_v47 = vadd.f32 %v854_v39, %v833_v53  ;;  %1227 = vrcp.f32 %v810_v42 }
 0x1cf   : > { %v1222_v48 = vpop.eup %1221  ;;  %901 = vst.msk [vmem:[%s1608_s30 + $0x48] sm:$0xff] %vm635_vm0, %v885_v45  ;;  %v792_v49 = vsel %vm791_vm1, %v1678_v60, %v790_v46 }
 0x1d0   : > { %v886_v61 = vmul.f32 0.5, %v870_v47  ;;  %v835_v51 = vmul.f32 %v1222_v48, %v1547_v7  ;;  %v795_v18 = vsel %vm793_vm2, %v794_v34, %v792_v49  ;;  %v857_v7 = vld [vmem:[%s1591_s27 + $0x68] sm:$0xff] }
 0x1d1   : > { %v811_v54 = vmax.f32 %v795_v18, 1e-12 }
 0x1d2   : > { %902 = vst.msk [vmem:[%s1608_s30 + $0x50] sm:$0xff] %vm635_vm0, %v886_v61  ;;  %v871_v55 = vadd.f32 %v855_v38, %v835_v51 }
 0x1d3   : > { %v1224_v56 = vpop.eup %1223  ;;  %1229 = vrcp.f32 %v811_v54 }
 0x1d4   : > { %v887_v50 = vmul.f32 0.5, %v871_v55  ;;  %v837_v59 = vmul.f32 %v1224_v56, %v1552_v15 }
 0x1d6   : > { %903 = vst.msk [vmem:[%s1608_s30 + $0x58] sm:$0xff] %vm635_vm0, %v887_v50  ;;  %v872_v52 = vadd.f32 %v856_v58, %v837_v59 }
 0x1d7   : > { %v1226_v60 = vpop.eup %1225 }
 0x1d8   : > { %v888_v62 = vmul.f32 0.5, %v872_v52  ;;  %v839_v63 = vmul.f32 %v1226_v60, %v1559_v26 }
 0x1da   : > { %904 = vst.msk [vmem:[%s1608_s30 + $0x60] sm:$0xff] %vm635_vm0, %v888_v62  ;;  %v873_v0 = vadd.f32 %v857_v7, %v839_v63 }
 0x1db   : > { %v1228_v1 = vpop.eup %1227 }
 0x1dc   : > { %v889_v4 = vmul.f32 0.5, %v873_v0  ;;  %v841_v5 = vmul.f32 %v1228_v1, %v1564_v33 }
 0x1de   : > { %905 = vst.msk [vmem:[%s1608_s30 + $0x68] sm:$0xff] %vm635_vm0, %v889_v4  ;;  %v874_v15 = vadd.f32 %v858_v25, %v841_v5 }
 0x1e0   : > { %v1230_v6 = vpop.eup %1229  ;;  %v890_v8 = vmul.f32 0.5, %v874_v15 }
 0x1e1   : > { %v843_v3 = vmul.f32 %v1230_v6, %v1571_v40 }
 0x1e2   : > { %906 = vst.msk [vmem:[%s1608_s30 + $0x70] sm:$0xff] %vm635_vm0, %v890_v8 }
 0x1e3   : > { %v875_v26 = vadd.f32 %v859_v57, %v843_v3 }
 0x1e5   : > { %v891_v10 = vmul.f32 0.5, %v875_v26 }
 0x1e7   : > { %907 = vst.msk [vmem:[%s1608_s30 + $0x78] sm:$0xff] %vm635_vm0, %v891_v10 }
 0x1e8 PF: > { %s14_s15 = sadd.s32 1, %s1237_s15  }
 0x1e9   : > { %p11_p4 = scmp.ge.s32.totalorder %s14_s15, 4  }
 0x1eb   :  { %13 = sbr.rel (!%p11_p4) target bundleno = 1 (0x1), region = 69 }

// kernel: tssgcf_forward.3
= control target key start
LH: loop header
LB: loop body
LE: loop exit
PB: predicated region body
PF: predicated region fallthrough
CT: control target
= control target key end

     0   :  { %vm426_vm0 = vcmask 523264   ;;  %s1558_s2 = inlined_call_operand.vmem [shape: f32[384,64], index: 2, kind: input, shape index: {}]   ;;  %s1559_s1 = inlined_call_operand.vmem [shape: f32[128,384], index: 1, kind: input, shape index: {}]   ;;  %s1560_s3 = inlined_call_operand.vmem [shape: f32[1,64], index: 3, kind: input, shape index: {}]   ;;  %s1561_s0 = inlined_call_operand.vmem [shape: f32[128,64], index: 0, kind: input, shape index: {}]   ;;  %s1562_s4 = inlined_call_operand.vmem [shape: f32[128,64], index: 4, kind: output, shape index: {}]  }
   0x1   :  { %v96_v0 = vld [vmem:[%s1558_s2 + $0xf8] sm:$0xff]  ;;  %v95_v2 = vld [vmem:[%s1558_s2 + $0xf0] sm:$0xff]  ;;  %v94_v5 = vld [vmem:[%s1558_s2 + $0xe8] sm:$0xff] }
   0x2   :  { %v80_v1 = vld [vmem:[%s1558_s2 + $0x78] sm:$0xff]  ;;  %704 = vmatprep.subr.mxu0 %v96_v0  ;;  %v79_v3 = vld [vmem:[%s1558_s2 + $0x70] sm:$0xff]  ;;  %v78_v7 = vld [vmem:[%s1558_s2 + $0x68] sm:$0xff] }
   0x3   :  { %v112_v4 = vld [vmem:[%s1558_s2 + $0x178] sm:$0xff]  ;;  %705 = vmatpush3.msra.mxu0 %v80_v1  ;;  %v111_v6 = vld [vmem:[%s1558_s2 + $0x170] sm:$0xff]  ;;  %v110_v8 = vld [vmem:[%s1558_s2 + $0x168] sm:$0xff] }
   0x4   :  { %816 = vmatprep.subr.mxu1 %v112_v4  ;;  %706 = vmatprep.subr.mxu0 %v95_v2  ;;  %v93_v9 = vld [vmem:[%s1558_s2 + $0xe0] sm:$0xff]  ;;  %v92_v12 = vld [vmem:[%s1558_s2 + $0xd8] sm:$0xff]  ;;  %v91_v15 = vld [vmem:[%s1558_s2 + $0xd0] sm:$0xff] }
   0x5   :  { %817 = vmatpush3.msra.mxu1 %v112_v4  ;;  %707 = vmatpush3.msra.mxu0 %v79_v3  ;;  %v77_v10 = vld [vmem:[%s1558_s2 + $0x60] sm:$0xff]  ;;  %v76_v13 = vld [vmem:[%s1558_s2 + $0x58] sm:$0xff]  ;;  %v75_v16 = vld [vmem:[%s1558_s2 + $0x50] sm:$0xff] }
   0x6   :  { %818 = vmatprep.subr.mxu1 %v111_v6  ;;  %708 = vmatprep.subr.mxu0 %v94_v5  ;;  %v109_v11 = vld [vmem:[%s1558_s2 + $0x160] sm:$0xff]  ;;  %v108_v14 = vld [vmem:[%s1558_s2 + $0x158] sm:$0xff]  ;;  %v107_v17 = vld [vmem:[%s1558_s2 + $0x150] sm:$0xff] }
   0x7   :  { %819 = vmatpush3.msra.mxu1 %v111_v6  ;;  %709 = vmatpush3.msra.mxu0 %v78_v7  ;;  %v90_v18 = vld [vmem:[%s1558_s2 + $0xc8] sm:$0xff]  ;;  %v89_v21 = vld [vmem:[%s1558_s2 + $0xc0] sm:$0xff]  ;;  %v88_v24 = vld [vmem:[%s1558_s2 + $0xb8] sm:$0xff] }
   0x8   :  { %820 = vmatprep.subr.mxu1 %v110_v8  ;;  %710 = vmatprep.subr.mxu0 %v93_v9  ;;  %v74_v19 = vld [vmem:[%s1558_s2 + $0x48] sm:$0xff]  ;;  %v73_v22 = vld [vmem:[%s1558_s2 + $0x40] sm:$0xff]  ;;  %v72_v25 = vld [vmem:[%s1558_s2 + $0x38] sm:$0xff] }
   0x9   :  { %821 = vmatpush3.msra.mxu1 %v110_v8  ;;  %711 = vmatpush3.msra.mxu0 %v77_v10  ;;  %v106_v20 = vld [vmem:[%s1558_s2 + $0x148] sm:$0xff]  ;;  %v105_v23 = vld [vmem:[%s1558_s2 + $0x140] sm:$0xff]  ;;  %v104_v26 = vld [vmem:[%s1558_s2 + $0x138] sm:$0xff] }
   0xa   :  { %822 = vmatprep.subr.mxu1 %v109_v11  ;;  %712 = vmatprep.subr.mxu0 %v92_v12  ;;  %v87_v27 = vld [vmem:[%s1558_s2 + $0xb0] sm:$0xff]  ;;  %v86_v30 = vld [vmem:[%s1558_s2 + $0xa8] sm:$0xff]  ;;  %v85_v33 = vld [vmem:[%s1558_s2 + $0xa0] sm:$0xff] }
   0xb   :  { %823 = vmatpush3.msra.mxu1 %v109_v11  ;;  %713 = vmatpush3.msra.mxu0 %v76_v13  ;;  %v71_v28 = vld [vmem:[%s1558_s2 + $0x30] sm:$0xff]  ;;  %v70_v31 = vld [vmem:[%s1558_s2 + $0x28] sm:$0xff]  ;;  %v69_v34 = vld [vmem:[%s1558_s2 + $0x20] sm:$0xff] }
   0xc   :  { %824 = vmatprep.subr.mxu1 %v108_v14  ;;  %714 = vmatprep.subr.mxu0 %v91_v15  ;;  %v103_v29 = vld [vmem:[%s1558_s2 + $0x130] sm:$0xff]  ;;  %v102_v32 = vld [vmem:[%s1558_s2 + $0x128] sm:$0xff]  ;;  %v101_v35 = vld [vmem:[%s1558_s2 + $0x120] sm:$0xff] }
   0xd   :  { %825 = vmatpush3.msra.mxu1 %v108_v14  ;;  %715 = vmatpush3.msra.mxu0 %v75_v16  ;;  %v84_v36 = vld [vmem:[%s1558_s2 + $0x98] sm:$0xff]  ;;  %v83_v39 = vld [vmem:[%s1558_s2 + $0x90] sm:$0xff]  ;;  %v82_v42 = vld [vmem:[%s1558_s2 + $0x88] sm:$0xff] }
   0xe   :  { %826 = vmatprep.subr.mxu1 %v107_v17  ;;  %716 = vmatprep.subr.mxu0 %v90_v18  ;;  %v68_v37 = vld [vmem:[%s1558_s2 + $0x18] sm:$0xff]  ;;  %v67_v40 = vld [vmem:[%s1558_s2 + $0x10] sm:$0xff]  ;;  %v18_v43 = vld [vmem:[%s1559_s1 + $0x8] sm:$0xff] }
   0xf   :  { %827 = vmatpush3.msra.mxu1 %v107_v17  ;;  %717 = vmatpush3.msra.mxu0 %v74_v19  ;;  %v100_v38 = vld [vmem:[%s1558_s2 + $0x118] sm:$0xff]  ;;  %v99_v41 = vld [vmem:[%s1558_s2 + $0x110] sm:$0xff]  ;;  %v66_v44 = vld [vmem:[%s1558_s2 + $0x8] sm:$0xff] }
  0x10   :  { %828 = vmatprep.subr.mxu1 %v106_v20  ;;  %718 = vmatprep.subr.mxu0 %v89_v21  ;;  %v81_v45 = vld [vmem:[%s1558_s2 + $0x80] sm:$0xff]  ;;  %v98_v46 = vld [vmem:[%s1558_s2 + $0x108] sm:$0xff]  ;;  %v19_v51 = vld [vmem:[%s1559_s1 + $0x10] sm:$0xff] }
  0x11   :  { %829 = vmatpush3.msra.mxu1 %v106_v20  ;;  %719 = vmatpush3.msra.mxu0 %v73_v22  ;;  %v65_v47 = vld [vmem:[%s1558_s2] sm:$0xff]  ;;  %v22_v52 = vld [vmem:[%s1559_s1 + $0x28] sm:$0xff]  ;;  %v20_v53 = vld [vmem:[%s1559_s1 + $0x18] sm:$0xff] }
  0x12   :  { %830 = vmatprep.subr.mxu1 %v105_v23  ;;  %720 = vmatprep.subr.mxu0 %v88_v24  ;;  %v17_v48 = vld [vmem:[%s1559_s1] sm:$0xff]  ;;  %v24_v55 = vld [vmem:[%s1559_s1 + $0x38] sm:$0xff]  ;;  %v23_v57 = vld [vmem:[%s1559_s1 + $0x30] sm:$0xff] }
  0x13   :  { %831 = vmatpush3.msra.mxu1 %v105_v23  ;;  %721 = vmatpush3.msra.mxu0 %v72_v25  ;;  %v97_v49 = vld [vmem:[%s1558_s2 + $0x100] sm:$0xff]  ;;  %v28_v56 = vld [vmem:[%s1559_s1 + $0x58] sm:$0xff]  ;;  %v31_v58 = vld [vmem:[%s1559_s1 + $0x70] sm:$0xff] }
  0x14   :  { %832 = vmatprep.subr.mxu1 %v104_v26  ;;  %722 = vmatprep.subr.mxu0 %v87_v27  ;;  %v21_v50 = vld [vmem:[%s1559_s1 + $0x20] sm:$0xff]  ;;  %v27_v59 = vld [vmem:[%s1559_s1 + $0x50] sm:$0xff]  ;;  %v34_v60 = vld [vmem:[%s1559_s1 + $0x88] sm:$0xff] }
  0x15   :  { %833 = vmatpush3.msra.mxu1 %v104_v26  ;;  %723 = vmatpush3.msra.mxu0 %v71_v28  ;;  %v25_v54 = vld [vmem:[%s1559_s1 + $0x40] sm:$0xff]  ;;  %v26_v61 = vld [vmem:[%s1559_s1 + $0x48] sm:$0xff]  ;;  %v40_v0 = vld [vmem:[%s1559_s1 + $0xb8] sm:$0xff] }
  0x16   :  { %834 = vmatprep.subr.mxu1 %v103_v29  ;;  %724 = vmatprep.subr.mxu0 %v86_v30  ;;  %v37_v62 = vld [vmem:[%s1559_s1 + $0xa0] sm:$0xff]  ;;  %v30_v63 = vld [vmem:[%s1559_s1 + $0x68] sm:$0xff]  ;;  %v43_v2 = vld [vmem:[%s1559_s1 + $0xd0] sm:$0xff] }
  0x17   :  { %835 = vmatpush3.msra.mxu1 %v103_v29  ;;  %725 = vmatpush3.msra.mxu0 %v70_v31  ;;  %v29_v1 = vld [vmem:[%s1559_s1 + $0x60] sm:$0xff]  ;;  %v46_v4 = vld [vmem:[%s1559_s1 + $0xe8] sm:$0xff]  ;;  %v32_v5 = vld [vmem:[%s1559_s1 + $0x78] sm:$0xff] }
  0x18   :  { %836 = vmatprep.subr.mxu1 %v102_v32  ;;  %726 = vmatprep.subr.mxu0 %v85_v33  ;;  %v33_v3 = vld [vmem:[%s1559_s1 + $0x80] sm:$0xff]  ;;  %v36_v7 = vld [vmem:[%s1559_s1 + $0x98] sm:$0xff]  ;;  %v35_v9 = vld [vmem:[%s1559_s1 + $0x90] sm:$0xff] }
  0x19   :  { %837 = vmatpush3.msra.mxu1 %v102_v32  ;;  %727 = vmatpush3.msra.mxu0 %v69_v34  ;;  %v49_v6 = vld [vmem:[%s1559_s1 + $0x100] sm:$0xff]  ;;  %v52_v8 = vld [vmem:[%s1559_s1 + $0x118] sm:$0xff]  ;;  %v55_v10 = vld [vmem:[%s1559_s1 + $0x130] sm:$0xff] }
  0x1a   :  { %838 = vmatprep.subr.mxu1 %v101_v35  ;;  %728 = vmatprep.subr.mxu0 %v84_v36  ;;  %v39_v11 = vld [vmem:[%s1559_s1 + $0xb0] sm:$0xff]  ;;  %v58_v12 = vld [vmem:[%s1559_s1 + $0x148] sm:$0xff]  ;;  %v61_v14 = vld [vmem:[%s1559_s1 + $0x160] sm:$0xff] }
  0x1b   :  { %839 = vmatpush3.msra.mxu1 %v101_v35  ;;  %729 = vmatpush3.msra.mxu0 %v68_v37  ;;  %v38_v13 = vld [vmem:[%s1559_s1 + $0xa8] sm:$0xff]  ;;  %v64_v16 = vld [vmem:[%s1559_s1 + $0x178] sm:$0xff]  ;;  %v41_v17 = vld [vmem:[%s1559_s1 + $0xc0] sm:$0xff] }
  0x1c   :  { %840 = vmatprep.subr.mxu1 %v100_v38  ;;  %730 = vmatprep.subr.mxu0 %v83_v39  ;;  %v42_v15 = vld [vmem:[%s1559_s1 + $0xc8] sm:$0xff]  ;;  %v45_v18 = vld [vmem:[%s1559_s1 + $0xe0] sm:$0xff]  ;;  %v44_v19 = vld [vmem:[%s1559_s1 + $0xd8] sm:$0xff] }
  0x1d   :  { %841 = vmatpush3.msra.mxu1 %v100_v38  ;;  %731 = vmatpush3.msra.mxu0 %v67_v40  ;;  %v48_v20 = vld [vmem:[%s1559_s1 + $0xf8] sm:$0xff]  ;;  %v47_v21 = vld [vmem:[%s1559_s1 + $0xf0] sm:$0xff]  ;;  %v50_v23 = vld [vmem:[%s1559_s1 + $0x108] sm:$0xff] }
  0x1e   :  { %842 = vmatprep.subr.mxu1 %v99_v41  ;;  %732 = vmatprep.subr.mxu0 %v82_v42  ;;  %v51_v22 = vld [vmem:[%s1559_s1 + $0x110] sm:$0xff]  ;;  %v54_v24 = vld [vmem:[%s1559_s1 + $0x128] sm:$0xff]  ;;  %v53_v25 = vld [vmem:[%s1559_s1 + $0x120] sm:$0xff] }
  0x1f   :  { %184 = vmatprep.mubr.f32.mxu0 %v18_v43  ;;  %733 = vmatpush3.msra.mxu0 %v66_v44  ;;  %v57_v26 = vld [vmem:[%s1559_s1 + $0x140] sm:$0xff]  ;;  %v56_v27 = vld [vmem:[%s1559_s1 + $0x138] sm:$0xff]  ;;  %v59_v29 = vld [vmem:[%s1559_s1 + $0x150] sm:$0xff] }
  0x20   :  { %843 = vmatpush3.msra.mxu1 %v99_v41  ;;  %734 = vmatprep.subr.mxu0 %v81_v45  ;;  %v60_v28 = vld [vmem:[%s1559_s1 + $0x158] sm:$0xff]  ;;  %v63_v30 = vld [vmem:[%s1559_s1 + $0x170] sm:$0xff]  ;;  %v62_v31 = vld [vmem:[%s1559_s1 + $0x168] sm:$0xff] }
  0x21   :  { %844 = vmatprep.subr.mxu1 %v98_v46  ;;  %735 = vmatpush3.msra.mxu0 %v65_v47  ;;  %v1252_v34 = vld [vmem:[%s1560_s3] ss:$0 sm:$0xff] }
  0x22   :  { %845 = vmatpush3.msra.mxu1 %v98_v46  ;;  %185 = vmatmul.mubr.f32.vlgmr.msra.gmra.mxu0 %v17_v48 }
  0x23   :  { %846 = vmatprep.subr.mxu1 %v97_v49  ;;  %189 = vmatprep.mubr.f32.mxu0 %v21_v50 }
  0x24   :  { %847 = vmatpush3.msra.mxu1 %v97_v49  ;;  %848 = vmatprep.mubr.f32.mxu1 %v19_v51 }
  0x25   :  { %849 = vmatmul.mubr.f32.vlgmr.msra.gmra.mxu1 %v22_v52 }
  0x26   :  { %190 = vmatmul.mubr.f32.gmra.mxu0 %v20_v53  ;;  %851 = vmatprep.mubr.f32.mxu1 %v25_v54 }
  0x27   :  { %194 = vmatprep.mubr.f32.mxu0 %v24_v55 }
  0x29   :  { %852 = vmatmul.mubr.f32.gmra.mxu1 %v28_v56 }
  0x2a   :  { %195 = vmatmul.mubr.f32.gmra.mxu0 %v23_v57  ;;  %854 = vmatprep.mubr.f32.mxu1 %v31_v58 }
  0x2b   :  { %199 = vmatprep.mubr.f32.mxu0 %v27_v59 }
  0x2d   :  { %855 = vmatmul.mubr.f32.gmra.mxu1 %v34_v60 }
  0x2e   :  { %200 = vmatmul.mubr.f32.gmra.mxu0 %v26_v61  ;;  %857 = vmatprep.mubr.f32.mxu1 %v37_v62 }
  0x2f   :  { %204 = vmatprep.mubr.f32.mxu0 %v30_v63 }
  0x31   :  { %858 = vmatmul.mubr.f32.gmra.mxu1 %v40_v0 }
  0x32   :  { %205 = vmatmul.mubr.f32.gmra.mxu0 %v29_v1  ;;  %860 = vmatprep.mubr.f32.mxu1 %v43_v2 }
  0x33   :  { %209 = vmatprep.mubr.f32.mxu0 %v33_v3 }
  0x35   :  { %861 = vmatmul.mubr.f32.gmra.mxu1 %v46_v4 }
  0x36   :  { %210 = vmatmul.mubr.f32.gmra.mxu0 %v32_v5  ;;  %863 = vmatprep.mubr.f32.mxu1 %v49_v6 }
  0x37   :  { %214 = vmatprep.mubr.f32.mxu0 %v36_v7 }
  0x39   :  { %864 = vmatmul.mubr.f32.gmra.mxu1 %v52_v8 }
  0x3a   :  { %215 = vmatmul.mubr.f32.gmra.mxu0 %v35_v9  ;;  %866 = vmatprep.mubr.f32.mxu1 %v55_v10 }
  0x3b   :  { %219 = vmatprep.mubr.f32.mxu0 %v39_v11 }
  0x3d   :  { %867 = vmatmul.mubr.f32.gmra.mxu1 %v58_v12 }
  0x3e   :  { %220 = vmatmul.mubr.f32.gmra.mxu0 %v38_v13  ;;  %869 = vmatprep.mubr.f32.mxu1 %v61_v14 }
  0x3f   :  { %224 = vmatprep.mubr.f32.mxu0 %v42_v15 }
  0x41   :  { %870 = vmatmul.mubr.f32.gmra.mxu1 %v64_v16 }
  0x42   :  { %225 = vmatmul.mubr.f32.gmra.mxu0 %v41_v17 }
  0x43   :  { %229 = vmatprep.mubr.f32.mxu0 %v45_v18 }
  0x46   :  { %230 = vmatmul.mubr.f32.gmra.mxu0 %v44_v19 }
  0x47   :  { %234 = vmatprep.mubr.f32.mxu0 %v48_v20 }
  0x4a   :  { %235 = vmatmul.mubr.f32.gmra.mxu0 %v47_v21 }
  0x4b   :  { %239 = vmatprep.mubr.f32.mxu0 %v51_v22 }
  0x4e   :  { %240 = vmatmul.mubr.f32.gmra.mxu0 %v50_v23 }
  0x4f   :  { %244 = vmatprep.mubr.f32.mxu0 %v54_v24 }
  0x52   :  { %245 = vmatmul.mubr.f32.gmra.mxu0 %v53_v25 }
  0x53   :  { %249 = vmatprep.mubr.f32.mxu0 %v57_v26 }
  0x56   :  { %250 = vmatmul.mubr.f32.gmra.mxu0 %v56_v27 }
  0x57   :  { %254 = vmatprep.mubr.f32.mxu0 %v60_v28 }
  0x5a   :  { %255 = vmatmul.mubr.f32.gmra.mxu0 %v59_v29 }
  0x5b   :  { %259 = vmatprep.mubr.f32.mxu0 %v63_v30 }
  0x5e   :  { %260 = vmatmul.mubr.f32.gmra.mxu0 %v62_v31 }
  0xe2   :  { %v736_v32 = vpop.f32.mrf.mxu0 }
  0xe4   :  { %v737_v33 = vpop.f32.mrf.mxu0 }
  0xe5   :  { %v738_v35 = vadd.f32 %v737_v33, %v736_v32  ;;  %v850_v36 = vpop.f32.mrf.mxu1 }
  0xe6   :  { %v739_v37 = vpop.f32.mrf.mxu0 }
  0xe7   :  { %v187_v38 = vadd.f32 %v738_v35, %v1252_v34  ;;  %v331_v39 = vpop.f32.mrf.mxu1 }
  0xe8   :  { %v740_v40 = vpop.f32.mrf.mxu0 }
  0xe9   :  { %v741_v41 = vadd.f32 %v740_v40, %v739_v37  ;;  %v1255_v42 = vadd.f32 %v331_v39, %v187_v38  ;;  %v853_v44 = vpop.f32.mrf.mxu1 }
  0xea   :  { %v742_v43 = vpop.f32.mrf.mxu0 }
  0xeb   :  { %v192_v45 = vadd.f32 %v741_v41, %v1252_v34  ;;  %v410_v46 = vmul.f32 %v1255_v42, %v1255_v42  ;;  %v341_v52 = vpop.f32.mrf.mxu1 }
  0xec   :  { %v743_v47 = vpop.f32.mrf.mxu0 }
  0xed   :  { %v744_v48 = vadd.f32 %v743_v47, %v742_v43  ;;  %v427_v49 = vsel %vm426_vm0, %v410_v46, 0.0  ;;  %v1261_v50 = vadd.f32 %v850_v36, %v192_v45  ;;  %v856_v60 = vpop.f32.mrf.mxu1 }
  0xee   :  { %v745_v51 = vpop.f32.mrf.mxu0  ;;  %428 = vadd.xlane.f32.xlu0 %v427_v49 }
  0xef   :  { %v197_v53 = vadd.f32 %v744_v48, %v1252_v34  ;;  %v411_v54 = vmul.f32 %v1261_v50, %v1261_v50  ;;  %v351_v4 = vpop.f32.mrf.mxu1 }
  0xf0   :  { %v746_v55 = vpop.f32.mrf.mxu0 }
  0xf1   :  { %v747_v56 = vadd.f32 %v746_v55, %v745_v51  ;;  %v1266_v57 = vadd.f32 %v341_v52, %v197_v53  ;;  %v430_v58 = vsel %vm426_vm0, %v411_v54, 0.0  ;;  %v859_v12 = vpop.f32.mrf.mxu1 }
  0xf2   :  { %v748_v59 = vpop.f32.mrf.mxu0  ;;  %431 = vadd.xlane.f32.xlu0 %v430_v58 }
  0xf3   :  { %v202_v61 = vadd.f32 %v747_v56, %v1252_v34  ;;  %v412_v62 = vmul.f32 %v1266_v57, %v1266_v57  ;;  %v361_v20 = vpop.f32.mrf.mxu1 }
  0xf4   :  { %v749_v63 = vpop.f32.mrf.mxu0 }
  0xf5   :  { %v750_v0 = vadd.f32 %v749_v63, %v748_v59  ;;  %v433_v1 = vsel %vm426_vm0, %v412_v62, 0.0  ;;  %v1273_v2 = vadd.f32 %v853_v44, %v202_v61  ;;  %v862_v28 = vpop.f32.mrf.mxu1 }
  0xf6   :  { %v751_v3 = vpop.f32.mrf.mxu0  ;;  %434 = vadd.xlane.f32.xlu1 %v433_v1 }
  0xf7   :  { %v207_v5 = vadd.f32 %v750_v0, %v1252_v34  ;;  %v413_v6 = vmul.f32 %v1273_v2, %v1273_v2  ;;  %v371_v37 = vpop.f32.mrf.mxu1 }
  0xf8   :  { %v752_v7 = vpop.f32.mrf.mxu0 }
  0xf9   :  { %v753_v8 = vadd.f32 %v752_v7, %v751_v3  ;;  %v1278_v9 = vadd.f32 %v351_v4, %v207_v5  ;;  %v436_v10 = vsel %vm426_vm0, %v413_v6, 0.0  ;;  %v865_v46 = vpop.f32.mrf.mxu1 }
  0xfa   :  { %v754_v11 = vpop.f32.mrf.mxu0  ;;  %437 = vadd.xlane.f32.xlu1 %v436_v10 }
  0xfb   :  { %v212_v13 = vadd.f32 %v753_v8, %v1252_v34  ;;  %v414_v14 = vmul.f32 %v1278_v9, %v1278_v9  ;;  %v381_v55 = vpop.f32.mrf.mxu1 }
  0xfc   :  { %v755_v15 = vpop.f32.mrf.mxu0 }
  0xfd   :  { %v756_v16 = vadd.f32 %v755_v15, %v754_v11  ;;  %v439_v17 = vsel %vm426_vm0, %v414_v14, 0.0  ;;  %v1285_v18 = vadd.f32 %v856_v60, %v212_v13  ;;  %v868_v0 = vpop.f32.mrf.mxu1 }
  0xfe   :  { %v757_v19 = vpop.f32.mrf.mxu0  ;;  %440 = vadd.xlane.f32.xlu0 %v439_v17 }
  0xff   :  { %v217_v21 = vadd.f32 %v756_v16, %v1252_v34  ;;  %v415_v22 = vmul.f32 %v1285_v18, %v1285_v18  ;;  %v391_v10 = vpop.f32.mrf.mxu1 }
 0x100   :  { %v758_v23 = vpop.f32.mrf.mxu0 }
 0x101   :  { %v759_v24 = vadd.f32 %v758_v23, %v757_v19  ;;  %v1290_v25 = vadd.f32 %v361_v20, %v217_v21  ;;  %v442_v26 = vsel %vm426_vm0, %v415_v22, 0.0  ;;  %v871_v19 = vpop.f32.mrf.mxu1 }
 0x102   :  { %v760_v27 = vpop.f32.mrf.mxu0  ;;  %443 = vadd.xlane.f32.xlu1 %v442_v26 }
 0x103   :  { %v222_v29 = vadd.f32 %v759_v24, %v1252_v34  ;;  %v416_v30 = vmul.f32 %v1290_v25, %v1290_v25 }
 0x104   :  { %v761_v31 = vpop.f32.mrf.mxu0 }
 0x105   :  { %v762_v32 = vadd.f32 %v761_v31, %v760_v27  ;;  %v445_v33 = vsel %vm426_vm0, %v416_v30, 0.0  ;;  %v1297_v35 = vadd.f32 %v859_v12, %v222_v29 }
 0x106   :  { %v763_v36 = vpop.f32.mrf.mxu0  ;;  %446 = vadd.xlane.f32.xlu0 %v445_v33 }
 0x107   :  { %v227_v38 = vadd.f32 %v762_v32, %v1252_v34  ;;  %v417_v39 = vmul.f32 %v1297_v35, %v1297_v35 }
 0x108   :  { %v764_v40 = vpop.f32.mrf.mxu0 }
 0x109   :  { %v765_v41 = vadd.f32 %v764_v40, %v763_v36  ;;  %v1302_v43 = vadd.f32 %v371_v37, %v227_v38  ;;  %v448_v44 = vsel %vm426_vm0, %v417_v39, 0.0 }
 0x10a   :  { %v766_v45 = vpop.f32.mrf.mxu0  ;;  %449 = vadd.xlane.f32.xlu1 %v448_v44 }
 0x10b   :  { %v232_v47 = vadd.f32 %v765_v41, %v1252_v34  ;;  %v418_v48 = vmul.f32 %v1302_v43, %v1302_v43 }
 0x10c   :  { %v767_v49 = vpop.f32.mrf.mxu0 }
 0x10d   :  { %v768_v51 = vadd.f32 %v767_v49, %v766_v45  ;;  %v451_v52 = vsel %vm426_vm0, %v418_v48, 0.0  ;;  %v1309_v53 = vadd.f32 %v862_v28, %v232_v47  ;;  %v401_v28 = vpop.f32.mrf.mxu1 }
 0x10e   :  { %v769_v54 = vpop.f32.mrf.mxu0  ;;  %452 = vadd.xlane.f32.xlu0 %v451_v52 }
 0x10f   :  { %v237_v56 = vadd.f32 %v768_v51, %v1252_v34  ;;  %v419_v58 = vmul.f32 %v1309_v53, %v1309_v53 }
 0x110   :  { %v770_v59 = vpop.f32.mrf.mxu0 }
 0x111   :  { %v771_v60 = vadd.f32 %v770_v59, %v769_v54  ;;  %v1314_v61 = vadd.f32 %v381_v55, %v237_v56  ;;  %v454_v62 = vsel %vm426_vm0, %v419_v58, 0.0 }
 0x112   :  { %v772_v63 = vpop.f32.mrf.mxu0  ;;  %455 = vadd.xlane.f32.xlu1 %v454_v62 }
 0x113   :  { %v242_v1 = vadd.f32 %v771_v60, %v1252_v34  ;;  %v420_v3 = vmul.f32 %v1314_v61, %v1314_v61 }
 0x114   :  { %v773_v4 = vpop.f32.mrf.mxu0 }
 0x115   :  { %v774_v5 = vadd.f32 %v773_v4, %v772_v63  ;;  %v457_v6 = vsel %vm426_vm0, %v420_v3, 0.0  ;;  %v1321_v7 = vadd.f32 %v865_v46, %v242_v1 }
 0x116   :  { %v775_v8 = vpop.f32.mrf.mxu0  ;;  %458 = vadd.xlane.f32.xlu0 %v457_v6 }
 0x117   :  { %v247_v11 = vadd.f32 %v774_v5, %v1252_v34  ;;  %v421_v12 = vmul.f32 %v1321_v7, %v1321_v7 }
 0x118   :  { %v776_v13 = vpop.f32.mrf.mxu0 }
 0x119   :  { %v777_v14 = vadd.f32 %v776_v13, %v775_v8  ;;  %v1326_v15 = vadd.f32 %v391_v10, %v247_v11  ;;  %v460_v16 = vsel %vm426_vm0, %v421_v12, 0.0 }
 0x11a   :  { %v778_v17 = vpop.f32.mrf.mxu0  ;;  %461 = vadd.xlane.f32.xlu1 %v460_v16 }
 0x11b   :  { %v252_v20 = vadd.f32 %v777_v14, %v1252_v34  ;;  %v422_v21 = vmul.f32 %v1326_v15, %v1326_v15 }
 0x11c   :  { %v779_v22 = vpop.f32.mrf.mxu0 }
 0x11d   :  { %v780_v23 = vadd.f32 %v779_v22, %v778_v17  ;;  %v463_v24 = vsel %vm426_vm0, %v422_v21, 0.0  ;;  %v1333_v26 = vadd.f32 %v868_v0, %v252_v20 }
 0x11e   :  { %v781_v27 = vpop.f32.mrf.mxu0  ;;  %464 = vadd.xlane.f32.xlu0 %v463_v24 }
 0x11f   :  { %v257_v29 = vadd.f32 %v780_v23, %v1252_v34  ;;  %v423_v30 = vmul.f32 %v1333_v26, %v1333_v26 }
 0x120   :  { %v782_v31 = vpop.f32.mrf.mxu0 }
 0x121   :  { %v783_v32 = vadd.f32 %v782_v31, %v781_v27  ;;  %v1338_v33 = vadd.f32 %v401_v28, %v257_v29  ;;  %v466_v36 = vsel %vm426_vm0, %v423_v30, 0.0  ;;  %v635_v29 = vld [vmem:[%s1561_s0] sm:$0xff] }
 0x122   :  { %467 = vadd.xlane.f32.xlu1 %v466_v36 }
 0x123   :  { %v262_v37 = vadd.f32 %v783_v32, %v1252_v34  ;;  %v424_v38 = vmul.f32 %v1338_v33, %v1338_v33 }
 0x125   :  { %v469_v39 = vsel %vm426_vm0, %v424_v38, 0.0  ;;  %v1345_v40 = vadd.f32 %v871_v19, %v262_v37 }
 0x126   :  { %470 = vadd.xlane.f32.xlu0 %v469_v39 }
 0x127   :  { %v425_v41 = vmul.f32 %v1345_v40, %v1345_v40 }
 0x129   :  { %v472_v44 = vsel %vm426_vm0, %v425_v41, 0.0 }
 0x12a   :  { %473 = vadd.xlane.f32.xlu1 %v472_v44 }
 0x177   :  { %v429_v45 = vpop.xlane.xlu0 %428 }
 0x178   :  { %872 = vrsqrt.f32 %v429_v45  ;;  %vm477_vm1 = vcmp.eq.f32.partialorder %v429_v45, inf  ;;  %v480_v51 = vand.u32 2147483648, %v429_v45  ;;  %vm479_vm2 = vcmp.eq.f32.partialorder %v429_v45, 0.0 }
 0x17b   :  { %v432_v46 = vpop.xlane.xlu0 %431 }
 0x17c   :  { %874 = vrsqrt.f32 %v432_v46  ;;  %vm484_vm3 = vcmp.eq.f32.partialorder %v432_v46, inf  ;;  %v487_v60 = vand.u32 2147483648, %v432_v46  ;;  %vm486_vm4 = vcmp.eq.f32.partialorder %v432_v46, 0.0 }
 0x17f   :  { %v435_v47 = vpop.xlane.xlu1 %434 }
 0x180   :  { %876 = vrsqrt.f32 %v435_v47  ;;  %vm491_vm5 = vcmp.eq.f32.partialorder %v435_v47, inf  ;;  %v494_v5 = vand.u32 2147483648, %v435_v47  ;;  %vm493_vm6 = vcmp.eq.f32.partialorder %v435_v47, 0.0 }
 0x183   :  { %v438_v34 = vpop.xlane.xlu1 %437 }
 0x184   :  { %878 = vrsqrt.f32 %v438_v34  ;;  %vm498_vm7 = vcmp.eq.f32.partialorder %v438_v34, inf  ;;  %v501_v14 = vand.u32 2147483648, %v438_v34  ;;  %vm500_vm8 = vcmp.eq.f32.partialorder %v438_v34, 0.0 }
 0x185   :  { %v873_v48 = vpop.eup %872 }
 0x186   :  { %v476_v49 = vmul.f32 %v873_v48, %v429_v45 }
 0x187   :  { %v441_v52 = vpop.xlane.xlu0 %440 }
 0x188   :  { %v478_v54 = vsel %vm477_vm1, %v429_v45, %v476_v49  ;;  %880 = vrsqrt.f32 %v441_v52  ;;  %vm505_vm9 = vcmp.eq.f32.partialorder %v441_v52, inf  ;;  %v508_v23 = vand.u32 2147483648, %v441_v52  ;;  %v636_v45 = vld [vmem:[%s1561_s0 + $0x8] sm:$0xff] }
 0x189   :  { %v875_v55 = vpop.eup %874  ;;  %v481_v56 = vsel %vm479_vm2, %v480_v51, %v478_v54  ;;  %vm507_vm10 = vcmp.eq.f32.partialorder %v441_v52, 0.0 }
 0x18a   :  { %v587_v58 = vmax.f32 %v481_v56, 1e-12  ;;  %v483_v59 = vmul.f32 %v875_v55, %v432_v46 }
 0x18b   :  { %v444_v62 = vpop.xlane.xlu1 %443 }
 0x18c   :  { %882 = vrcp.f32 %v587_v58  ;;  %v485_v63 = vsel %vm484_vm3, %v432_v46, %v483_v59  ;;  %vm512_vm11 = vcmp.eq.f32.partialorder %v444_v62, inf  ;;  %v515_v41 = vand.u32 2147483648, %v444_v62 }
 0x18d   :  { %v877_v0 = vpop.eup %876  ;;  %v488_v1 = vsel %vm486_vm4, %v487_v60, %v485_v63  ;;  %884 = vrsqrt.f32 %v444_v62  ;;  %vm514_vm12 = vcmp.eq.f32.partialorder %v444_v62, 0.0 }
 0x18e   :  { %v588_v3 = vmax.f32 %v488_v1, 1e-12  ;;  %v490_v4 = vmul.f32 %v877_v0, %v435_v47 }
 0x18f   :  { %v1350_v6 = vpop.xlane.xlu0 %446 }
 0x190   :  { %886 = vrcp.f32 %v588_v3  ;;  %v492_v8 = vsel %vm491_vm5, %v435_v47, %v490_v4  ;;  %vm519_vm13 = vcmp.eq.f32.partialorder %v1350_v6, inf  ;;  %v522_v55 = vand.u32 2147483648, %v1350_v6 }
 0x191   :  { %v879_v10 = vpop.eup %878  ;;  %v495_v11 = vsel %vm493_vm6, %v494_v5, %v492_v8  ;;  %888 = vrsqrt.f32 %v1350_v6  ;;  %vm521_vm14 = vcmp.eq.f32.partialorder %v1350_v6, 0.0 }
 0x192   :  { %v589_v12 = vmax.f32 %v495_v11, 1e-12  ;;  %v497_v13 = vmul.f32 %v879_v10, %v438_v34 }
 0x193   :  { %v1353_v16 = vpop.xlane.xlu1 %449 }
 0x194   :  { %890 = vrcp.f32 %v589_v12  ;;  %v499_v17 = vsel %vm498_vm7, %v438_v34, %v497_v13  ;;  %vm526_vm15 = vcmp.eq.f32.partialorder %v1353_v16, inf  ;;  %v529_v5 = vand.u32 2147483648, %v1353_v16 }
 0x195   :  { %v881_v19 = vpop.eup %880  ;;  %v502_v20 = vsel %vm500_vm8, %v501_v14, %v499_v17  ;;  %892 = vrsqrt.f32 %v1353_v16  ;;  %vm528_vm1 = vcmp.eq.f32.partialorder %v1353_v16, 0.0 }
 0x196   :  { %v590_v21 = vmax.f32 %v502_v20, 1e-12  ;;  %v504_v22 = vmul.f32 %v881_v19, %v441_v52 }
 0x197   :  { %v1356_v24 = vpop.xlane.xlu0 %452 }
 0x198   :  { %894 = vrcp.f32 %v590_v21  ;;  %v506_v27 = vsel %vm505_vm9, %v441_v52, %v504_v22  ;;  %vm533_vm2 = vcmp.eq.f32.partialorder %v1356_v24, inf  ;;  %vm535_vm3 = vcmp.eq.f32.partialorder %v1356_v24, 0.0 }
 0x199   :  { %v883_v28 = vpop.eup %882  ;;  %v509_v30 = vsel %vm507_vm10, %v508_v23, %v506_v27  ;;  %896 = vrsqrt.f32 %v1356_v24 }
 0x19a   :  { %v885_v31 = vpop.eup %884  ;;  %v604_v32 = vmul.f32 %v883_v28, %v1255_v42  ;;  %v591_v36 = vmax.f32 %v509_v30, 1e-12 }
 0x19b   :  { %v511_v37 = vmul.f32 %v885_v31, %v444_v62  ;;  %v1363_v38 = vpop.xlane.xlu1 %455 }
 0x19c   :  { %v651_v39 = vadd.f32 %v635_v29, %v604_v32  ;;  %898 = vrcp.f32 %v591_v36  ;;  %vm540_vm4 = vcmp.eq.f32.partialorder %v1363_v38, inf  ;;  %vm542_vm5 = vcmp.eq.f32.partialorder %v1363_v38, 0.0 }
 0x19d   :  { %v887_v44 = vpop.eup %886  ;;  %v513_v46 = vsel %vm512_vm11, %v444_v62, %v511_v37  ;;  %900 = vrsqrt.f32 %v1363_v38 }
 0x19e   :  { %v889_v47 = vpop.eup %888  ;;  %v667_v34 = vmul.f32 0.5, %v651_v39  ;;  %v606_v42 = vmul.f32 %v887_v44, %v1261_v50  ;;  %v516_v48 = vsel %vm514_vm12, %v515_v41, %v513_v46  ;;  %v637_v50 = vld [vmem:[%s1561_s0 + $0x10] sm:$0xff]  ;;  %v640_v44 = vld [vmem:[%s1561_s0 + $0x28] sm:$0xff] }
 0x19f   :  { %v592_v49 = vmax.f32 %v516_v48, 1e-12  ;;  %v518_v51 = vmul.f32 %v889_v47, %v1350_v6  ;;  %v1371_v52 = vpop.xlane.xlu0 %458 }
 0x1a0   :  { %683 = vst.msk [vmem:[%s1562_s4] sm:$0xff] %vm426_vm0, %v667_v34  ;;  %v652_v54 = vadd.f32 %v636_v45, %v606_v42  ;;  %902 = vrsqrt.f32 %v1371_v52  ;;  %vm547_vm6 = vcmp.eq.f32.partialorder %v1371_v52, inf  ;;  %v550_v42 = vand.u32 2147483648, %v1371_v52 }
 0x1a1   :  { %v891_v56 = vpop.eup %890  ;;  %904 = vrcp.f32 %v592_v49  ;;  %v520_v58 = vsel %vm519_vm13, %v1350_v6, %v518_v51  ;;  %vm549_vm7 = vcmp.eq.f32.partialorder %v1371_v52, 0.0 }
 0x1a2   :  { %v893_v59 = vpop.eup %892  ;;  %v668_v60 = vmul.f32 0.5, %v652_v54  ;;  %v608_v62 = vmul.f32 %v891_v56, %v1266_v57  ;;  %v523_v63 = vsel %vm521_vm14, %v522_v55, %v520_v58  ;;  %v638_v57 = vld [vmem:[%s1561_s0 + $0x18] sm:$0xff]  ;;  %v641_v55 = vld [vmem:[%s1561_s0 + $0x30] sm:$0xff] }
 0x1a3   :  { %v593_v0 = vmax.f32 %v523_v63, 1e-12  ;;  %v525_v1 = vmul.f32 %v893_v59, %v1353_v16  ;;  %v1387_v3 = vpop.xlane.xlu1 %461 }
 0x1a4   :  { %684 = vst.msk [vmem:[%s1562_s4 + $0x8] sm:$0xff] %vm426_vm0, %v668_v60  ;;  %v653_v4 = vadd.f32 %v637_v50, %v608_v62  ;;  %906 = vrsqrt.f32 %v1387_v3  ;;  %vm554_vm8 = vcmp.eq.f32.partialorder %v1387_v3, inf  ;;  %vm556_vm9 = vcmp.eq.f32.partialorder %v1387_v3, 0.0 }
 0x1a5   :  { %v895_v6 = vpop.eup %894  ;;  %908 = vrcp.f32 %v593_v0  ;;  %v527_v8 = vsel %vm526_vm15, %v1353_v16, %v525_v1  ;;  %v536_v16 = vand.u32 2147483648, %v1356_v24 }
 0x1a6   :  { %v897_v10 = vpop.eup %896  ;;  %v669_v11 = vmul.f32 0.5, %v653_v4  ;;  %v610_v12 = vmul.f32 %v895_v6, %v1273_v2  ;;  %v530_v13 = vsel %vm528_vm1, %v529_v5, %v527_v8  ;;  %v639_v2 = vld [vmem:[%s1561_s0 + $0x20] sm:$0xff]  ;;  %v642_v4 = vld [vmem:[%s1561_s0 + $0x38] sm:$0xff] }
 0x1a7   :  { %v594_v14 = vmax.f32 %v530_v13, 1e-12  ;;  %v532_v17 = vmul.f32 %v897_v10, %v1356_v24  ;;  %v1403_v19 = vpop.xlane.xlu0 %464 }
 0x1a8   :  { %685 = vst.msk [vmem:[%s1562_s4 + $0x10] sm:$0xff] %vm426_vm0, %v669_v11  ;;  %v654_v20 = vadd.f32 %v638_v57, %v610_v12  ;;  %910 = vrsqrt.f32 %v1403_v19  ;;  %vm561_vm10 = vcmp.eq.f32.partialorder %v1403_v19, inf  ;;  %v564_v8 = vand.u32 2147483648, %v1403_v19 }
 0x1a9   :  { %v899_v21 = vpop.eup %898  ;;  %912 = vrcp.f32 %v594_v14  ;;  %v534_v22 = vsel %vm533_vm2, %v1356_v24, %v532_v17  ;;  %v543_v24 = vand.u32 2147483648, %v1363_v38  ;;  %vm563_vm11 = vcmp.eq.f32.partialorder %v1403_v19, 0.0 }
 0x1aa   :  { %v901_v23 = vpop.eup %900  ;;  %v670_v27 = vmul.f32 0.5, %v654_v20  ;;  %v612_v28 = vmul.f32 %v899_v21, %v1278_v9  ;;  %v537_v29 = vsel %vm535_vm3, %v536_v16, %v534_v22 }
 0x1ab   :  { %v595_v30 = vmax.f32 %v537_v29, 1e-12  ;;  %v539_v31 = vmul.f32 %v901_v23, %v1363_v38  ;;  %v1419_v32 = vpop.xlane.xlu1 %467 }
 0x1ac   :  { %686 = vst.msk [vmem:[%s1562_s4 + $0x18] sm:$0xff] %vm426_vm0, %v670_v27  ;;  %v655_v36 = vadd.f32 %v639_v2, %v612_v28  ;;  %914 = vrsqrt.f32 %v1419_v32  ;;  %vm568_vm12 = vcmp.eq.f32.partialorder %v1419_v32, inf  ;;  %vm570_vm13 = vcmp.eq.f32.partialorder %v1419_v32, 0.0 }
 0x1ad   :  { %v903_v37 = vpop.eup %902  ;;  %916 = vrcp.f32 %v595_v30  ;;  %v541_v9 = vsel %vm540_vm4, %v1363_v38, %v539_v31 }
 0x1ae   :  { %v905_v39 = vpop.eup %904  ;;  %v671_v41 = vmul.f32 0.5, %v655_v36  ;;  %v544_v45 = vsel %vm542_vm5, %v543_v24, %v541_v9  ;;  %v546_v46 = vmul.f32 %v903_v37, %v1371_v52 }
 0x1af   :  { %v614_v47 = vmul.f32 %v905_v39, %v1285_v18  ;;  %v596_v34 = vmax.f32 %v544_v45, 1e-12  ;;  %v1437_v48 = vpop.xlane.xlu0 %470 }
 0x1b0   :  { %687 = vst.msk [vmem:[%s1562_s4 + $0x20] sm:$0xff] %vm426_vm0, %v671_v41  ;;  %v548_v38 = vsel %vm547_vm6, %v1371_v52, %v546_v46  ;;  %918 = vrsqrt.f32 %v1437_v48  ;;  %v557_v52 = vand.u32 2147483648, %v1387_v3  ;;  %vm575_vm14 = vcmp.eq.f32.partialorder %v1437_v48, inf }
 0x1b1   :  { %v907_v49 = vpop.eup %906  ;;  %v656_v18 = vadd.f32 %v640_v44, %v614_v47  ;;  %920 = vrcp.f32 %v596_v34  ;;  %v551_v51 = vsel %vm549_vm7, %v550_v42, %v548_v38  ;;  %vm577_vm15 = vcmp.eq.f32.partialorder %v1437_v48, 0.0 }
 0x1b2   :  { %v909_v54 = vpop.eup %908  ;;  %v597_v56 = vmax.f32 %v551_v51, 1e-12  ;;  %v553_v50 = vmul.f32 %v907_v49, %v1387_v3 }
 0x1b3   :  { %v672_v58 = vmul.f32 0.5, %v656_v18  ;;  %v616_v59 = vmul.f32 %v909_v54, %v1290_v25  ;;  %v1453_v60 = vpop.xlane.xlu1 %473 }
 0x1b4   :  { %922 = vrcp.f32 %v597_v56  ;;  %v555_v62 = vsel %vm554_vm8, %v1387_v3, %v553_v50  ;;  %vm582_vm1 = vcmp.eq.f32.partialorder %v1453_v60, inf  ;;  %v585_v42 = vand.u32 2147483648, %v1453_v60  ;;  %v647_v50 = vld [vmem:[%s1561_s0 + $0x60] sm:$0xff] }
 0x1b5   :  { %v911_v63 = vpop.eup %910  ;;  %688 = vst.msk [vmem:[%s1562_s4 + $0x28] sm:$0xff] %vm426_vm0, %v672_v58  ;;  %v657_v0 = vadd.f32 %v641_v55, %v616_v59  ;;  %v558_v1 = vsel %vm556_vm9, %v557_v52, %v555_v62  ;;  %924 = vrsqrt.f32 %v1453_v60  ;;  %vm584_vm2 = vcmp.eq.f32.partialorder %v1453_v60, 0.0 }
 0x1b6   :  { %v913_v25 = vpop.eup %912  ;;  %v598_v5 = vmax.f32 %v558_v1, 1e-12  ;;  %v560_v6 = vmul.f32 %v911_v63, %v1403_v19  ;;  %v649_v1 = vld [vmem:[%s1561_s0 + $0x70] sm:$0xff] }
 0x1b7   :  { %v673_v57 = vmul.f32 0.5, %v657_v0  ;;  %v618_v3 = vmul.f32 %v913_v25, %v1297_v35  ;;  %v643_v35 = vld [vmem:[%s1561_s0 + $0x40] sm:$0xff] }
 0x1b8   :  { %926 = vrcp.f32 %v598_v5  ;;  %v562_v10 = vsel %vm561_vm10, %v1403_v19, %v560_v6  ;;  %v571_v19 = vand.u32 2147483648, %v1419_v32 }
 0x1b9   :  { %v915_v11 = vpop.eup %914  ;;  %689 = vst.msk [vmem:[%s1562_s4 + $0x30] sm:$0xff] %vm426_vm0, %v673_v57  ;;  %v658_v12 = vadd.f32 %v642_v4, %v618_v3  ;;  %v565_v13 = vsel %vm563_vm11, %v564_v8, %v562_v10  ;;  %v650_v57 = vld [vmem:[%s1561_s0 + $0x78] sm:$0xff] }
 0x1ba   :  { %v917_v14 = vpop.eup %916  ;;  %v599_v17 = vmax.f32 %v565_v13, 1e-12  ;;  %v567_v20 = vmul.f32 %v915_v11, %v1419_v32 }
 0x1bb   :  { %v674_v16 = vmul.f32 0.5, %v658_v12  ;;  %v620_v21 = vmul.f32 %v917_v14, %v1302_v43  ;;  %v644_v43 = vld [vmem:[%s1561_s0 + $0x48] sm:$0xff] }
 0x1bc   :  { %928 = vrcp.f32 %v599_v17  ;;  %v569_v2 = vsel %vm568_vm12, %v1419_v32, %v567_v20  ;;  %v578_v32 = vand.u32 2147483648, %v1437_v48 }
 0x1bd   :  { %v919_v22 = vpop.eup %918  ;;  %690 = vst.msk [vmem:[%s1562_s4 + $0x38] sm:$0xff] %vm426_vm0, %v674_v16  ;;  %v659_v23 = vadd.f32 %v643_v35, %v620_v21  ;;  %v572_v27 = vsel %vm570_vm13, %v571_v19, %v569_v2 }
 0x1be   :  { %v921_v28 = vpop.eup %920  ;;  %v600_v29 = vmax.f32 %v572_v27, 1e-12  ;;  %v574_v30 = vmul.f32 %v919_v22, %v1437_v48 }
 0x1bf   :  { %v675_v31 = vmul.f32 0.5, %v659_v23  ;;  %v622_v36 = vmul.f32 %v921_v28, %v1309_v53  ;;  %v645_v53 = vld [vmem:[%s1561_s0 + $0x50] sm:$0xff] }
 0x1c0   :  { %930 = vrcp.f32 %v600_v29  ;;  %v576_v24 = vsel %vm575_vm14, %v1437_v48, %v574_v30 }
 0x1c1   :  { %v923_v37 = vpop.eup %922  ;;  %691 = vst.msk [vmem:[%s1562_s4 + $0x40] sm:$0xff] %vm426_vm0, %v675_v31  ;;  %v660_v9 = vadd.f32 %v644_v43, %v622_v36  ;;  %v579_v39 = vsel %vm577_vm15, %v578_v32, %v576_v24 }
 0x1c2   :  { %v925_v41 = vpop.eup %924  ;;  %v624_v44 = vmul.f32 %v923_v37, %v1314_v61  ;;  %v601_v45 = vmax.f32 %v579_v39, 1e-12  ;;  %v646_v61 = vld [vmem:[%s1561_s0 + $0x58] sm:$0xff] }
 0x1c3   :  { %v676_v46 = vmul.f32 0.5, %v660_v9  ;;  %v581_v47 = vmul.f32 %v925_v41, %v1453_v60 }
 0x1c4   :  { %v661_v34 = vadd.f32 %v645_v53, %v624_v44  ;;  %932 = vrcp.f32 %v601_v45 }
 0x1c5   :  { %v927_v48 = vpop.eup %926  ;;  %692 = vst.msk [vmem:[%s1562_s4 + $0x48] sm:$0xff] %vm426_vm0, %v676_v46  ;;  %v583_v38 = vsel %vm582_vm1, %v1453_v60, %v581_v47  ;;  %v648_v60 = vld [vmem:[%s1561_s0 + $0x68] sm:$0xff] }
 0x1c6   :  { %v677_v49 = vmul.f32 0.5, %v661_v34  ;;  %v626_v18 = vmul.f32 %v927_v48, %v1321_v7  ;;  %v586_v51 = vsel %vm584_vm2, %v585_v42, %v583_v38 }
 0x1c7   :  { %v602_v54 = vmax.f32 %v586_v51, 1e-12 }
 0x1c8   :  { %693 = vst.msk [vmem:[%s1562_s4 + $0x50] sm:$0xff] %vm426_vm0, %v677_v49  ;;  %v662_v55 = vadd.f32 %v646_v61, %v626_v18 }
 0x1c9   :  { %v929_v56 = vpop.eup %928  ;;  %934 = vrcp.f32 %v602_v54 }
 0x1ca   :  { %v678_v58 = vmul.f32 0.5, %v662_v55  ;;  %v628_v59 = vmul.f32 %v929_v56, %v1326_v15 }
 0x1cc   :  { %694 = vst.msk [vmem:[%s1562_s4 + $0x58] sm:$0xff] %vm426_vm0, %v678_v58  ;;  %v663_v7 = vadd.f32 %v647_v50, %v628_v59 }
 0x1cd   :  { %v931_v52 = vpop.eup %930 }
 0x1ce   :  { %v679_v62 = vmul.f32 0.5, %v663_v7  ;;  %v630_v63 = vmul.f32 %v931_v52, %v1333_v26 }
 0x1d0   :  { %695 = vst.msk [vmem:[%s1562_s4 + $0x60] sm:$0xff] %vm426_vm0, %v679_v62  ;;  %v664_v15 = vadd.f32 %v648_v60, %v630_v63 }
 0x1d1   :  { %v933_v0 = vpop.eup %932 }
 0x1d2   :  { %v680_v25 = vmul.f32 0.5, %v664_v15  ;;  %v632_v4 = vmul.f32 %v933_v0, %v1338_v33 }
 0x1d4   :  { %696 = vst.msk [vmem:[%s1562_s4 + $0x68] sm:$0xff] %vm426_vm0, %v680_v25  ;;  %v665_v26 = vadd.f32 %v649_v1, %v632_v4 }
 0x1d6   :  { %v935_v5 = vpop.eup %934  ;;  %v681_v6 = vmul.f32 0.5, %v665_v26 }
 0x1d7   :  { %v634_v3 = vmul.f32 %v935_v5, %v1345_v40 }
 0x1d8   :  { %697 = vst.msk [vmem:[%s1562_s4 + $0x70] sm:$0xff] %vm426_vm0, %v681_v6 }
 0x1d9   :  { %v666_v33 = vadd.f32 %v650_v57, %v634_v3 }
 0x1db   :  { %v682_v8 = vmul.f32 0.5, %v666_v33 }
 0x1dd   :  { %698 = vst.msk [vmem:[%s1562_s4 + $0x78] sm:$0xff] %vm426_vm0, %v682_v8 }

</bundles_post_ra>
